<compile_context>
chip_gen: v5e
topology: v5e:2x2
jax: 0.10.0
libtpu: 0.0.40
codegen_flags: <defaults>
</compile_context>

<pallas_src>
import functools

import jax
import jax.numpy as jnp
from jax import lax
from jax.experimental import pallas as pl
from jax.experimental.pallas import tpu as pltpu


def _round_up(a, b):
    return (a + b - 1) // b * b


def _lora_linear_kernel(x_ref, w_ref, proj_ref, v1_ref, std1_ref, mean1_ref,
                        v2_ref, std2_ref, mean2_ref, bias_ref, o_ref,
                        acc_ref, xa_ref, *, mult_scale):
    """out tile = x @ W.T + (x @ A.T) @ B * mult_scale + bias, fp32 accumulate."""
    k = pl.program_id(2)

    @pl.when(k == 0)
    def _():
        acc_ref[...] = jnp.zeros_like(acc_ref)
        xa_ref[...] = jnp.zeros_like(xa_ref)

    x = x_ref[...]                                                    # (tm, tk)

    # Base linear: x @ W.T with W in native (out_dim, in_dim) layout
    # (contract the shared in_dim axis on both operands -> no transpose).
    acc_ref[...] += lax.dot_general(x, w_ref[...],
                                    (((1,), (1,)), ((), ())),
                                    preferred_element_type=jnp.float32)

    # LoRA left factor for this K chunk: A.T_k = (v1_k @ proj.T)*std1_k + mean1_k
    a_t = lax.dot_general(v1_ref[...], proj_ref[...],
                          (((1,), (1,)), ((), ())),
                          preferred_element_type=jnp.float32)         # (tk, R)
    a_t = (a_t * std1_ref[...].astype(jnp.float32)
           + mean1_ref[...].astype(jnp.float32))
    # xa accumulates x @ A.T over K (rank-R => ~R/tn extra MXU work per step).
    xa_ref[...] += jnp.dot(x, a_t.astype(x.dtype),
                           preferred_element_type=jnp.float32)        # (tm, R)

    @pl.when(k == pl.num_programs(2) - 1)
    def _():
        # LoRA right factor for this N tile: B = (proj @ v2_tile.T)*std2 + mean2
        b = lax.dot_general(proj_ref[...], v2_ref[...],
                            (((1,), (1,)), ((), ())),
                            preferred_element_type=jnp.float32)       # (R, tn)
        b = (b * std2_ref[...].astype(jnp.float32)
             + mean2_ref[...].astype(jnp.float32))
        delta = jnp.dot(xa_ref[...], b, preferred_element_type=jnp.float32)
        o_ref[...] = (acc_ref[...] + mult_scale * delta
                      + bias_ref[...].astype(jnp.float32)).astype(o_ref.dtype)


def lora_w2w_forward(x, w, bias, proj, v1, v2, std1, mean1, std2, mean2,
                     *, multiplier, scale, tm=None, tn=None, tk=None):
    T, in_dim = x.shape
    out_dim = w.shape[0]
    R, P = proj.shape
    dt = x.dtype
    mult_scale = float(multiplier) * float(scale)

    # --- tile selection -------------------------------------------------------
    if tm is None:
        # bf16 packs 16 rows per sublane group; prefer 128 for mid-size T to
        # limit pad waste, 256 only for long sequences.
        tm = 256 if T >= 512 else (128 if T >= 128 else _round_up(T, 16))
    if tn is None:
        if out_dim % 128 == 0:
            tn = min(512, out_dim)
            while out_dim % tn:       # 512 -> 256 -> 128, always terminates
                tn //= 2
        elif out_dim < 128:
            tn = out_dim              # tiny layer: full (masked-store) tile
        else:
            tn = 128                  # boundary block partially OOB; those output
                                      # columns are discarded by the final slice
    if tk is None:
        # K-tile only for large in_dim so VMEM stays bounded (v7x: 64 MiB
        # physical); otherwise keep the whole reduction resident (k_tiles==1
        # also keeps the W tile resident across the inner token sweep).
        tk = 1024 if (in_dim > 2048 and in_dim % 1024 == 0) else in_dim
    assert in_dim % tk == 0, "K tile must divide in_dim (no garbage in reduction)"

    t_pad = _round_up(T, tm)
    n_tiles = pl.cdiv(out_dim, tn)
    t_tiles = t_pad // tm
    k_tiles = in_dim // tk

    # Only the small operands get wrapper-side reshapes/pads; W stays untouched.
    x_p = x if t_pad == T else jnp.pad(x, ((0, t_pad - T), (0, 0)))
    bias_r = bias.reshape(1, out_dim)
    std1_c = std1.reshape(in_dim, 1)
    mean1_c = mean1.reshape(in_dim, 1)
    std2_r = std2.reshape(1, out_dim)
    mean2_r = mean2.reshape(1, out_dim)

    out = pl.pallas_call(
        functools.partial(_lora_linear_kernel, mult_scale=mult_scale),
        out_shape=jax.ShapeDtypeStruct((t_pad, out_dim), dt),
        grid_spec=pltpu.PrefetchScalarGridSpec(
            num_scalar_prefetch=0,
            grid=(n_tiles, t_tiles, k_tiles),       # token axis inner vs. N,
            in_specs=[                              # reduction axis innermost
                pl.BlockSpec((tm, tk), lambda j, i, k: (i, k)),   # x
                pl.BlockSpec((tn, tk), lambda j, i, k: (j, k)),   # W (native layout)
                pl.BlockSpec((R, P), lambda j, i, k: (0, 0)),     # proj
                pl.BlockSpec((tk, P), lambda j, i, k: (k, 0)),    # v1
                pl.BlockSpec((tk, 1), lambda j, i, k: (k, 0)),    # std1 (column)
                pl.BlockSpec((tk, 1), lambda j, i, k: (k, 0)),    # mean1 (column)
                pl.BlockSpec((tn, P), lambda j, i, k: (j, 0)),    # v2
                pl.BlockSpec((1, tn), lambda j, i, k: (0, j)),    # std2 (row)
                pl.BlockSpec((1, tn), lambda j, i, k: (0, j)),    # mean2 (row)
                pl.BlockSpec((1, tn), lambda j, i, k: (0, j)),    # bias (row)
            ],
            out_specs=pl.BlockSpec((tm, tn), lambda j, i, k: (i, j)),
            scratch_shapes=[pltpu.VMEM((tm, tn), jnp.float32),    # fp32 accumulator
                            pltpu.VMEM((tm, R), jnp.float32)]),   # x @ A.T accumulator
        compiler_params=pltpu.CompilerParams(
            dimension_semantics=("parallel", "parallel", "arbitrary"),
            vmem_limit_bytes=64 * 1024 * 1024),
    )(x_p, w, proj, v1, std1_c, mean1_c, v2, std2_r, mean2_r, bias_r)

    return out[:T] if t_pad != T else out


if __name__ == "__main__":
    # Small shapes consistent with the module (a Linear with a rank-4 w2w LoRA).
    T = 64            # tokens
    in_dim = 256      # org_module.in_features
    out_dim = 256     # org_module.out_features
    P = 16            # w2w projection basis dim
    lora_dim = 4      # rank R (proj has R rows)
    alpha = 1
    multiplier = 1.0
    scale = alpha / lora_dim

    key = jax.random.PRNGKey(0)
    ks = jax.random.split(key, 7)
    bf16 = jnp.bfloat16

    x    = jax.random.normal(ks[0], (T, in_dim), dtype=jnp.float32).astype(bf16)
    w    = (0.05 * jax.random.normal(ks[1], (out_dim, in_dim))).astype(bf16)
    bias = (0.05 * jax.random.normal(ks[2], (out_dim,))).astype(bf16)
    proj = jax.random.normal(ks[3], (lora_dim, P)).astype(bf16)
    v    = jax.random.normal(ks[4], (in_dim + out_dim, P)).astype(bf16)
    mean = (0.1 * jax.random.normal(ks[5], (in_dim + out_dim,))).astype(bf16)
    std  = jax.random.uniform(ks[6], (in_dim + out_dim,), minval=0.1,
                              maxval=1.0).astype(bf16)

    # Slicing exactly as in LoRAModule.__init__
    v1, v2 = v[:in_dim], v[in_dim:]
    mean1, mean2 = mean[:in_dim], mean[in_dim:]
    std1, std2 = std[:in_dim], std[in_dim:]

    # Plain-JAX fp32 reference.
    xf = x.astype(jnp.float32)
    A = (proj.astype(jnp.float32) @ v1.astype(jnp.float32).T
         * std1.astype(jnp.float32) + mean1.astype(jnp.float32))
    B = (proj.astype(jnp.float32) @ v2.astype(jnp.float32).T
         * std2.astype(jnp.float32) + mean2.astype(jnp.float32))
    ref = (xf @ w.astype(jnp.float32).T + bias.astype(jnp.float32)
           + xf @ A.T @ B * multiplier * scale)

    def check(out):
        out = jax.block_until_ready(out)
        assert out.shape == (T, out_dim) and out.dtype == bf16
        err = jnp.max(jnp.abs(out.astype(jnp.float32) - ref)) / (
            jnp.max(jnp.abs(ref)) + 1e-6)
        assert float(err) < 5e-2, f"mismatch: rel err {float(err)}"

    # 1) Default (auto) tiling: single-tile grid.
    check(lora_w2w_forward(x, w, bias, proj, v1, v2, std1, mean1, std2, mean2,
                           multiplier=multiplier, scale=scale))

    # 2) Forced multi-tile grid (2 out tiles x 2 token tiles x 2 K tiles) to
    #    exercise the accumulator init/finalize path and all index maps.
    check(lora_w2w_forward(x, w, bias, proj, v1, v2, std1, mean1, std2, mean2,
                           multiplier=multiplier, scale=scale,
                           tm=32, tn=128, tk=128))

    print("KERNEL_OK")
</pallas_src>

<mosaic_0001>
module attributes {stable_mosaic.version = 11 : i64} {
  func.func @_lora_linear_kernel(%arg0: i32, %arg1: i32, %arg2: i32, %arg3: memref<64x256xbf16, #tpu.memory_space<vmem>>, %arg4: memref<256x256xbf16, #tpu.memory_space<vmem>>, %arg5: memref<4x16xbf16, #tpu.memory_space<vmem>>, %arg6: memref<256x16xbf16, #tpu.memory_space<vmem>>, %arg7: memref<256x1xbf16, #tpu.memory_space<vmem>>, %arg8: memref<256x1xbf16, #tpu.memory_space<vmem>>, %arg9: memref<256x16xbf16, #tpu.memory_space<vmem>>, %arg10: memref<1x256xbf16, #tpu.memory_space<vmem>>, %arg11: memref<1x256xbf16, #tpu.memory_space<vmem>>, %arg12: memref<1x256xbf16, #tpu.memory_space<vmem>>, %arg13: memref<64x256xbf16, #tpu.memory_space<vmem>>, %arg14: memref<64x256xf32, #tpu.memory_space<vmem>>, %arg15: memref<64x4xf32, #tpu.memory_space<vmem>>) attributes {dimension_semantics = [#tpu.dimension_semantics<parallel>, #tpu.dimension_semantics<parallel>, #tpu.dimension_semantics<arbitrary>], iteration_bounds = array<i64: 1, 1, 1>, scalar_prefetch = 0 : i64, scratch_operands = 2 : i64, tpu.core_type = #tpu.core_type<tc>, window_params = [{transform_indices = @transform_0, window_bounds = array<i64: 64, 256>}, {transform_indices = @transform_1, window_bounds = array<i64: 256, 256>}, {pipeline_mode = #tpu.pipeline_mode<synchronous>, transform_indices = @transform_2, window_bounds = array<i64: 4, 16>}, {transform_indices = @transform_3, window_bounds = array<i64: 256, 16>}, {transform_indices = @transform_4, window_bounds = array<i64: 256, 1>}, {transform_indices = @transform_5, window_bounds = array<i64: 256, 1>}, {transform_indices = @transform_6, window_bounds = array<i64: 256, 16>}, {transform_indices = @transform_7, window_bounds = array<i64: 1, 256>}, {transform_indices = @transform_8, window_bounds = array<i64: 1, 256>}, {transform_indices = @transform_9, window_bounds = array<i64: 1, 256>}, {transform_indices = @transform_10, window_bounds = array<i64: 64, 256>}]} {
    %c0_i32 = arith.constant 0 : i32
    %0 = arith.cmpi eq, %arg2, %c0_i32 : i32
    %1 = arith.extui %0 : i1 to i32
    %c0_i32_0 = arith.constant 0 : i32
    %2 = arith.cmpi ne, %1, %c0_i32_0 : i32
    scf.if %2 {
      %cst_24 = arith.constant 0.000000e+00 : f32
      %28 = vector.broadcast %cst_24 : f32 to vector<64x256xf32>
      %c0_25 = arith.constant 0 : index
      %c0_26 = arith.constant 0 : index
      %29 = vector.load %arg14[%c0_25, %c0_26] : memref<64x256xf32, #tpu.memory_space<vmem>>, vector<64x256xf32>
      tpu.vector_store %arg14[%c0_25, %c0_26], %28 {strides = array<i32>} : memref<64x256xf32, #tpu.memory_space<vmem>>, vector<64x256xf32>,
      %cst_27 = arith.constant 0.000000e+00 : f32
      %30 = vector.broadcast %cst_27 : f32 to vector<64x4xf32>
      %c0_28 = arith.constant 0 : index
      %c0_29 = arith.constant 0 : index
      %31 = vector.load %arg15[%c0_28, %c0_29] : memref<64x4xf32, #tpu.memory_space<vmem>>, vector<64x4xf32>
      tpu.vector_store %arg15[%c0_28, %c0_29], %30 {strides = array<i32>} : memref<64x4xf32, #tpu.memory_space<vmem>>, vector<64x4xf32>,
    } else {
    }
    %c0 = arith.constant 0 : index
    %c0_1 = arith.constant 0 : index
    %3 = vector.load %arg3[%c0, %c0_1] : memref<64x256xbf16, #tpu.memory_space<vmem>>, vector<64x256xbf16>
    %c0_2 = arith.constant 0 : index
    %c0_3 = arith.constant 0 : index
    %4 = vector.load %arg14[%c0_2, %c0_3] : memref<64x256xf32, #tpu.memory_space<vmem>>, vector<64x256xf32>
    %c0_4 = arith.constant 0 : index
    %c0_5 = arith.constant 0 : index
    %5 = vector.load %arg4[%c0_4, %c0_5] : memref<256x256xbf16, #tpu.memory_space<vmem>>, vector<256x256xbf16>
    %cst = arith.constant dense<0.000000e+00> : vector<64x256xf32>
    %6 = tpu.matmul %3, %5, %cst {dimension_numbers = #tpu.dot_dimension_numbers<[1], [1], [0], [0], [0, 0, 1, 0], [], []>} : vector<64x256xbf16>, vector<256x256xbf16>, vector<64x256xf32> -> vector<64x256xf32>
    %7 = arith.addf %4, %6 : vector<64x256xf32>
    %c0_6 = arith.constant 0 : index
    %c0_7 = arith.constant 0 : index
    %8 = vector.load %arg14[%c0_6, %c0_7] : memref<64x256xf32, #tpu.memory_space<vmem>>, vector<64x256xf32>
    tpu.vector_store %arg14[%c0_6, %c0_7], %7 {strides = array<i32>} : memref<64x256xf32, #tpu.memory_space<vmem>>, vector<64x256xf32>,
    %c0_8 = arith.constant 0 : index
    %c0_9 = arith.constant 0 : index
    %9 = vector.load %arg6[%c0_8, %c0_9] : memref<256x16xbf16, #tpu.memory_space<vmem>>, vector<256x16xbf16>
    %c0_10 = arith.constant 0 : index
    %c0_11 = arith.constant 0 : index
    %10 = vector.load %arg5[%c0_10, %c0_11] : memref<4x16xbf16, #tpu.memory_space<vmem>>, vector<4x16xbf16>
    %cst_12 = arith.constant dense<0.000000e+00> : vector<256x4xf32>
    %11 = tpu.matmul %9, %10, %cst_12 {dimension_numbers = #tpu.dot_dimension_numbers<[1], [1], [0], [0], [0, 0, 1, 0], [], []>} : vector<256x16xbf16>, vector<4x16xbf16>, vector<256x4xf32> -> vector<256x4xf32>
    %c0_13 = arith.constant 0 : index
    %c0_14 = arith.constant 0 : index
    %12 = vector.load %arg7[%c0_13, %c0_14] : memref<256x1xbf16, #tpu.memory_space<vmem>>, vector<256x1xbf16>
    %13 = arith.extf %12 : vector<256x1xbf16> to vector<256x1xf32>
    %14 = vector.broadcast %13 : vector<256x1xf32> to vector<256x4xf32>
    %15 = arith.mulf %11, %14 : vector<256x4xf32>
    %c0_15 = arith.constant 0 : index
    %c0_16 = arith.constant 0 : index
    %16 = vector.load %arg8[%c0_15, %c0_16] : memref<256x1xbf16, #tpu.memory_space<vmem>>, vector<256x1xbf16>
    %17 = arith.extf %16 : vector<256x1xbf16> to vector<256x1xf32>
    %18 = vector.broadcast %17 : vector<256x1xf32> to vector<256x4xf32>
    %19 = arith.addf %15, %18 : vector<256x4xf32>
    %c0_17 = arith.constant 0 : index
    %c0_18 = arith.constant 0 : index
    %20 = vector.load %arg15[%c0_17, %c0_18] : memref<64x4xf32, #tpu.memory_space<vmem>>, vector<64x4xf32>
    %21 = arith.truncf %19 : vector<256x4xf32> to vector<256x4xbf16>
    %cst_19 = arith.constant dense<0.000000e+00> : vector<64x4xf32>
    %22 = tpu.matmul %3, %21, %cst_19 {dimension_numbers = #tpu.dot_dimension_numbers<[1], [0], [0], [1], [0, 0, 1, 1], [], []>} : vector<64x256xbf16>, vector<256x4xbf16>, vector<64x4xf32> -> vector<64x4xf32>
    %23 = arith.addf %20, %22 : vector<64x4xf32>
    %c0_20 = arith.constant 0 : index
    %c0_21 = arith.constant 0 : index
    %24 = vector.load %arg15[%c0_20, %c0_21] : memref<64x4xf32, #tpu.memory_space<vmem>>, vector<64x4xf32>
    tpu.vector_store %arg15[%c0_20, %c0_21], %23 {strides = array<i32>} : memref<64x4xf32, #tpu.memory_space<vmem>>, vector<64x4xf32>,
    %c0_i32_22 = arith.constant 0 : i32
    %25 = arith.cmpi eq, %arg2, %c0_i32_22 : i32
    %26 = arith.extui %25 : i1 to i32
    %c0_i32_23 = arith.constant 0 : i32
    %27 = arith.cmpi ne, %26, %c0_i32_23 : i32
    scf.if %27 {
      %c0_24 = arith.constant 0 : index
      %c0_25 = arith.constant 0 : index
      %28 = vector.load %arg5[%c0_24, %c0_25] : memref<4x16xbf16, #tpu.memory_space<vmem>>, vector<4x16xbf16>
      %c0_26 = arith.constant 0 : index
      %c0_27 = arith.constant 0 : index
      %29 = vector.load %arg9[%c0_26, %c0_27] : memref<256x16xbf16, #tpu.memory_space<vmem>>, vector<256x16xbf16>
      %cst_28 = arith.constant dense<0.000000e+00> : vector<4x256xf32>
      %30 = tpu.matmul %28, %29, %cst_28 {dimension_numbers = #tpu.dot_dimension_numbers<[1], [1], [0], [0], [0, 0, 1, 0], [], []>} : vector<4x16xbf16>, vector<256x16xbf16>, vector<4x256xf32> -> vector<4x256xf32>
      %c0_29 = arith.constant 0 : index
      %c0_30 = arith.constant 0 : index
      %31 = vector.load %arg10[%c0_29, %c0_30] : memref<1x256xbf16, #tpu.memory_space<vmem>>, vector<1x256xbf16>
      %32 = arith.extf %31 : vector<1x256xbf16> to vector<1x256xf32>
      %33 = vector.broadcast %32 : vector<1x256xf32> to vector<4x256xf32>
      %34 = arith.mulf %30, %33 : vector<4x256xf32>
      %c0_31 = arith.constant 0 : index
      %c0_32 = arith.constant 0 : index
      %35 = vector.load %arg11[%c0_31, %c0_32] : memref<1x256xbf16, #tpu.memory_space<vmem>>, vector<1x256xbf16>
      %36 = arith.extf %35 : vector<1x256xbf16> to vector<1x256xf32>
      %37 = vector.broadcast %36 : vector<1x256xf32> to vector<4x256xf32>
      %38 = arith.addf %34, %37 : vector<4x256xf32>
      %c0_33 = arith.constant 0 : index
      %c0_34 = arith.constant 0 : index
      %39 = vector.load %arg15[%c0_33, %c0_34] : memref<64x4xf32, #tpu.memory_space<vmem>>, vector<64x4xf32>
      %cst_35 = arith.constant dense<0.000000e+00> : vector<64x256xf32>
      %40 = tpu.matmul %39, %38, %cst_35 {dimension_numbers = #tpu.dot_dimension_numbers<[1], [0], [0], [1], [0, 0, 1, 1], [], []>} : vector<64x4xf32>, vector<4x256xf32>, vector<64x256xf32> -> vector<64x256xf32>
      %c0_36 = arith.constant 0 : index
      %c0_37 = arith.constant 0 : index
      %41 = vector.load %arg14[%c0_36, %c0_37] : memref<64x256xf32, #tpu.memory_space<vmem>>, vector<64x256xf32>
      %cst_38 = arith.constant 2.500000e-01 : f32
      %42 = vector.broadcast %cst_38 : f32 to vector<64x256xf32>
      %43 = arith.mulf %42, %40 : vector<64x256xf32>
      %44 = arith.addf %41, %43 : vector<64x256xf32>
      %c0_39 = arith.constant 0 : index
      %c0_40 = arith.constant 0 : index
      %45 = vector.load %arg12[%c0_39, %c0_40] : memref<1x256xbf16, #tpu.memory_space<vmem>>, vector<1x256xbf16>
      %46 = arith.extf %45 : vector<1x256xbf16> to vector<1x256xf32>
      %47 = vector.broadcast %46 : vector<1x256xf32> to vector<64x256xf32>
      %48 = arith.addf %44, %47 : vector<64x256xf32>
      %49 = arith.truncf %48 : vector<64x256xf32> to vector<64x256xbf16>
      %c0_41 = arith.constant 0 : index
      %c0_42 = arith.constant 0 : index
      %50 = vector.load %arg13[%c0_41, %c0_42] : memref<64x256xbf16, #tpu.memory_space<vmem>>, vector<64x256xbf16>
      tpu.vector_store %arg13[%c0_41, %c0_42], %49 {strides = array<i32>} : memref<64x256xbf16, #tpu.memory_space<vmem>>, vector<64x256xbf16>,
    } else {
    }
    return
  }
  func.func @transform_0(%arg0: i32, %arg1: i32, %arg2: i32) -> (i32, i32) {
    %c0_i32 = arith.constant 0 : i32
    return %arg1, %arg2 : i32, i32
  }
  func.func @transform_1(%arg0: i32, %arg1: i32, %arg2: i32) -> (i32, i32) {
    %c0_i32 = arith.constant 0 : i32
    return %arg0, %arg2 : i32, i32
  }
  func.func @transform_2(%arg0: i32, %arg1: i32, %arg2: i32) -> (i32, i32) {
    %c0_i32 = arith.constant 0 : i32
    %c0_i32_0 = arith.constant 0 : i32
    %c0_i32_1 = arith.constant 0 : i32
    return %c0_i32, %c0_i32_0 : i32, i32
  }
  func.func @transform_3(%arg0: i32, %arg1: i32, %arg2: i32) -> (i32, i32) {
    %c0_i32 = arith.constant 0 : i32
    %c0_i32_0 = arith.constant 0 : i32
    return %arg2, %c0_i32 : i32, i32
  }
  func.func @transform_4(%arg0: i32, %arg1: i32, %arg2: i32) -> (i32, i32) {
    %c0_i32 = arith.constant 0 : i32
    %c0_i32_0 = arith.constant 0 : i32
    return %arg2, %c0_i32 : i32, i32
  }
  func.func @transform_5(%arg0: i32, %arg1: i32, %arg2: i32) -> (i32, i32) {
    %c0_i32 = arith.constant 0 : i32
    %c0_i32_0 = arith.constant 0 : i32
    return %arg2, %c0_i32 : i32, i32
  }
  func.func @transform_6(%arg0: i32, %arg1: i32, %arg2: i32) -> (i32, i32) {
    %c0_i32 = arith.constant 0 : i32
    %c0_i32_0 = arith.constant 0 : i32
    return %arg0, %c0_i32 : i32, i32
  }
  func.func @transform_7(%arg0: i32, %arg1: i32, %arg2: i32) -> (i32, i32) {
    %c0_i32 = arith.constant 0 : i32
    %c0_i32_0 = arith.constant 0 : i32
    return %c0_i32, %arg0 : i32, i32
  }
  func.func @transform_8(%arg0: i32, %arg1: i32, %arg2: i32) -> (i32, i32) {
    %c0_i32 = arith.constant 0 : i32
    %c0_i32_0 = arith.constant 0 : i32
    return %c0_i32, %arg0 : i32, i32
  }
  func.func @transform_9(%arg0: i32, %arg1: i32, %arg2: i32) -> (i32, i32) {
    %c0_i32 = arith.constant 0 : i32
    %c0_i32_0 = arith.constant 0 : i32
    return %c0_i32, %arg0 : i32, i32
  }
  func.func @transform_10(%arg0: i32, %arg1: i32, %arg2: i32) -> (i32, i32) {
    %c0_i32 = arith.constant 0 : i32
    return %arg1, %arg0 : i32, i32
  }
}

</mosaic_0001>

<bundles_post_ra>
// kernel: tpu_custom_call.1
= control target key start
LH: loop header
LB: loop body
LE: loop exit
PB: predicated region body
PF: predicated region fallthrough
CT: control target
= control target key end

     0   :  { %vm583_vm0 = vcmask 130048   ;;  %v2526_v4 = vmov 0   ;;  %s3448_s0 = inlined_call_operand.vmem [shape: bf16[64,256], index: 0, kind: input, shape index: {}]   ;;  %s3449_s1 = inlined_call_operand.vmem [shape: bf16[256,256], index: 1, kind: input, shape index: {}]   ;;  %s3450_s2 = inlined_call_operand.vmem [shape: bf16[4,16], index: 2, kind: input, shape index: {}]   ;;  %s3451_s3 = inlined_call_operand.vmem [shape: bf16[256,16], index: 3, kind: input, shape index: {}]   ;;  %s3452_s4 = inlined_call_operand.vmem [shape: bf16[256,1], index: 4, kind: input, shape index: {}]   ;;  %s3453_s5 = inlined_call_operand.vmem [shape: bf16[256,1], index: 5, kind: input, shape index: {}]   ;;  %s3454_s6 = inlined_call_operand.vmem [shape: bf16[256,16], index: 6, kind: input, shape index: {}]   ;;  %s3455_s7 = inlined_call_operand.vmem [shape: bf16[1,256], index: 7, kind: input, shape index: {}]   ;;  %s3456_s8 = inlined_call_operand.vmem [shape: bf16[1,256], index: 8, kind: input, shape index: {}]   ;;  %s3457_s9 = inlined_call_operand.vmem [shape: bf16[1,256], index: 9, kind: input, shape index: {}]   ;;  %s3458_s10 = inlined_call_operand.hbm [shape: bf16[64,256], index: 10, kind: output, shape index: {}]  }
   0x1   :  { %v502_v0 = vld [vmem:[%s3450_s2] sm:$0x3]  ;;  %v2308_v1 = vld [vmem:[%s3452_s4 + $0x38] sm:$0xff]   ;;  %v2307_v2 = vld [vmem:[%s3452_s4 + $0x30] sm:$0xff]   ;;  %2337 = vset.pattern.permute.xlu0 %v2526_v4  ;;  %2348 = vset.pattern.permute.xlu1 %v2526_v4 }
   0x2   :  { %v633_v3 = vsel %vm583_vm0, %v502_v0, 0  ;;  %v2204_v5 = vunpack.c.l.bf16 %v2308_v1  ;;  %v2205_v6 = vunpack.c.h.bf16 %v2308_v1  ;;  %v2200_v7 = vunpack.c.l.bf16 %v2307_v2  ;;  %v2306_v8 = vld [vmem:[%s3452_s4 + $0x28] sm:$0xff]   ;;  %2359 = vset.pattern.permute.xlu2 %v2526_v4  ;;  %v2323_v12 = vld [vmem:[%s3453_s5 + $0x38] sm:$0xff]   ;;  %v2322_v14 = vld [vmem:[%s3453_s5 + $0x30] sm:$0xff]  }
   0x3   :  { %642 = vmatpush.bf16.xpose.msra.mxu0 %v633_v3  ;;  %v2201_v9 = vunpack.c.h.bf16 %v2307_v2  ;;  %v2196_v10 = vunpack.c.l.bf16 %v2306_v8  ;;  %v2197_v11 = vunpack.c.h.bf16 %v2306_v8  ;;  %v2321_v15 = vld [vmem:[%s3453_s5 + $0x28] sm:$0xff]   ;;  %v2142_v18 = vld [vmem:[%s3451_s3] sm:$0xff]  ;;  %v2268_v19 = vunpack.c.l.bf16 %v2323_v12 }
   0x4   :  { %v2338_v13 = vpack.i.bf16 %v2205_v6, %v2204_v5  ;;  %v2269_v20 = vunpack.c.h.bf16 %v2323_v12  ;;  %v2264_v21 = vunpack.c.l.bf16 %v2322_v14  ;;  %v2265_v22 = vunpack.c.h.bf16 %v2322_v14 }
   0x5   :  { %v2349_v16 = vpack.i.bf16 %v2201_v9, %v2200_v7  ;;  %v2360_v17 = vpack.i.bf16 %v2197_v11, %v2196_v10  ;;  %v2260_v23 = vunpack.c.l.bf16 %v2321_v15  ;;  %v2261_v24 = vunpack.c.h.bf16 %v2321_v15 }
   0x6   :  { %2339 = vperm.xlu0 %2337, %v2338_v13  }
   0x7   :  { %2350 = vperm.xlu1 %2348, %v2349_v16   ;;  %2361 = vperm.xlu2 %2359, %v2360_v17  }
   0x8   :  { %15 = vsyncpa [#allocation5], 0  ;;  %v2343_v25 = vpack.i.bf16 %v2269_v20, %v2268_v19  ;;  %v2354_v26 = vpack.i.bf16 %v2265_v22, %v2264_v21  ;;  %v2365_v27 = vpack.i.bf16 %v2261_v24, %v2260_v23  ;;  %v2305_v28 = vld [vmem:[%s3452_s4 + $0x20] sm:$0xff]   ;;  %v2304_v30 = vld [vmem:[%s3452_s4 + $0x18] sm:$0xff]   ;;  %vm57_vm1 = vcmask 31744   ;;  %s1766_s26 = sshll.u32 %s3458_s10, 4  ;;  %s1767_s26 = int_to_ptr.hbm [resolvable:$true] %s1766_s26 }
   0x9   :  { %v2320_v29 = vld [vmem:[%s3453_s5 + $0x20] sm:$0xff]   ;;  %v2192_v31 = vunpack.c.l.bf16 %v2305_v28  ;;  %v2193_v32 = vunpack.c.h.bf16 %v2305_v28  ;;  %v2188_v35 = vunpack.c.l.bf16 %v2304_v30  ;;  %v2189_v36 = vunpack.c.h.bf16 %v2304_v30  ;;  %v2319_v40 = vld [vmem:[%s3453_s5 + $0x18] sm:$0xff]   ;;  %v2303_v41 = vld [vmem:[%s3452_s4 + $0x10] sm:$0xff]   ;;  %s2530_s27 = smov 8  }
   0xa   :  { %2002 = vmatmul.msk.bf16.vlgmr.msra.gmra.mxu0 %vm583_vm0, %v2142_v18  ;;  %v2256_v33 = vunpack.c.l.bf16 %v2320_v29  ;;  %v2257_v34 = vunpack.c.h.bf16 %v2320_v29  ;;  %v2318_v42 = vld [vmem:[%s3453_s5 + $0x10] sm:$0xff]   ;;  %v2143_v43 = vld [vmem:[%s3451_s3 + $0x8] sm:$0xff]  ;;  %v2252_v44 = vunpack.c.l.bf16 %v2319_v40  ;;  %v2253_v45 = vunpack.c.h.bf16 %v2319_v40  ;;  %v2175_v55 = vld [vmem:[%s3452_s4] sm:$0xff]  }
   0xb   :  { %v2370_v37 = vpack.i.bf16 %v2193_v32, %v2192_v31  ;;  %v2380_v39 = vpack.i.bf16 %v2189_v36, %v2188_v35  ;;  %v2184_v46 = vunpack.c.l.bf16 %v2303_v41  ;;  %v2185_v47 = vunpack.c.h.bf16 %v2303_v41  ;;  %v2302_v53 = vld [vmem:[%s3452_s4 + $0x8] sm:$0xff]   ;;  %v2239_v1 = vld [vmem:[%s3453_s5] sm:$0xff]   ;;  %v2144_v2 = vld [vmem:[%s3451_s3 + $0x10] sm:$0xff] }
   0xc   :  { %v2375_v38 = vpack.i.bf16 %v2257_v34, %v2256_v33  ;;  %v2248_v48 = vunpack.c.l.bf16 %v2318_v42  ;;  %v2249_v49 = vunpack.c.h.bf16 %v2318_v42  ;;  %v2385_v50 = vpack.i.bf16 %v2253_v45, %v2252_v44  ;;  %v2317_v54 = vld [vmem:[%s3453_s5 + $0x8] sm:$0xff]   ;;  %v1868_v6 = vld [vmem:[%s3449_s1 + $0x70] sm:$0xf]  ;;  %v2125_v7 = vld [vmem:[%s3449_s1 + $0x74] sm:$0xf0] }
   0xd   :  { %v2390_v51 = vpack.i.bf16 %v2185_v47, %v2184_v46  ;;  %v2180_v56 = vunpack.c.l.bf16 %v2302_v53  ;;  %v2181_v57 = vunpack.c.h.bf16 %v2302_v53  ;;  %v2244_v58 = vunpack.c.l.bf16 %v2317_v54  ;;  %v1860_v9 = vld [vmem:[%s3449_s1 + $0x60] sm:$0xf]  ;;  %v2123_v10 = vld [vmem:[%s3449_s1 + $0x64] sm:$0xf0]  ;;  %v2145_v12 = vld [vmem:[%s3451_s3 + $0x18] sm:$0xff] }
   0xe   :  { %2344 = vperm.xlu0 %2337, %v2343_v25   ;;  %v2395_v52 = vpack.i.bf16 %v2249_v49, %v2248_v48  ;;  %v2245_v59 = vunpack.c.h.bf16 %v2317_v54  ;;  %v2176_v60 = vunpack.c.l.bf16 %v2175_v55  ;;  %v2177_v61 = vunpack.c.h.bf16 %v2175_v55  ;;  %v1852_v13 = vld [vmem:[%s3449_s1 + $0x50] sm:$0xf]  ;;  %v2121_v14 = vld [vmem:[%s3449_s1 + $0x54] sm:$0xf0]  ;;  %v1844_v16 = vld [vmem:[%s3449_s1 + $0x40] sm:$0xf] }
   0xf   :  { %2355 = vperm.xlu1 %2348, %v2354_v26   ;;  %2366 = vperm.xlu2 %2359, %v2365_v27   ;;  %v2400_v62 = vpack.i.bf16 %v2181_v57, %v2180_v56  ;;  %v2240_v3 = vunpack.c.l.bf16 %v2239_v1  ;;  %v2241_v4 = vunpack.c.h.bf16 %v2239_v1  ;;  %v1869_v8 = vor.u32 %v2125_v7, %v1868_v6  ;;  %v2119_v17 = vld [vmem:[%s3449_s1 + $0x44] sm:$0xf0]  ;;  %v2146_v19 = vld [vmem:[%s3451_s3 + $0x20] sm:$0xff]  ;;  %v2316_v20 = vld [vmem:[%s3452_s4 + $0x78] sm:$0xff]  }
  0x10   :  { %v2405_v63 = vpack.i.bf16 %v2245_v59, %v2244_v58  ;;  %v2410_v0 = vpack.i.bf16 %v2177_v61, %v2176_v60  ;;  %v1861_v11 = vor.u32 %v2123_v10, %v1860_v9  ;;  %v1853_v15 = vor.u32 %v2121_v14, %v1852_v13  ;;  %v1836_v23 = vld [vmem:[%s3449_s1 + $0x30] sm:$0xf]  ;;  %v2117_v24 = vld [vmem:[%s3449_s1 + $0x34] sm:$0xf0]  ;;  %v1828_v34 = vld [vmem:[%s3449_s1 + $0x20] sm:$0xf] }
  0x11   :  { %v2415_v5 = vpack.i.bf16 %v2241_v4, %v2240_v3  ;;  %322 = vmatpush.bf16.xpose.msra.mxu1 %v1869_v8  ;;  %v1845_v18 = vor.u32 %v2119_v17, %v1844_v16  ;;  %v2236_v21 = vunpack.c.l.bf16 %v2316_v20  ;;  %v2237_v22 = vunpack.c.h.bf16 %v2316_v20  ;;  %v2315_v25 = vld [vmem:[%s3452_s4 + $0x70] sm:$0xff]   ;;  %v2115_v35 = vld [vmem:[%s3449_s1 + $0x24] sm:$0xf0]  ;;  %v2313_v42 = vld [vmem:[%s3452_s4 + $0x60] sm:$0xff]  }
  0x12   :  { %v1837_v27 = vor.u32 %v2117_v24, %v1836_v23  ;;  %v2232_v28 = vunpack.c.l.bf16 %v2315_v25  ;;  %v2233_v29 = vunpack.c.h.bf16 %v2315_v25  ;;  %v2330_v31 = vld [vmem:[%s3453_s5 + $0x70] sm:$0xff]   ;;  %v2224_v44 = vunpack.c.l.bf16 %v2313_v42  ;;  %v2113_v47 = vld [vmem:[%s3449_s1 + $0x14] sm:$0xf0]  ;;  %v1812_v57 = vld [vmem:[%s3449_s1] sm:$0xf] }
  0x13   :  { %v2420_v26 = vpack.i.bf16 %v2237_v22, %v2236_v21  ;;  %v2296_v32 = vunpack.c.l.bf16 %v2330_v31  ;;  %v2297_v33 = vunpack.c.h.bf16 %v2330_v31  ;;  %v2225_v45 = vunpack.c.h.bf16 %v2313_v42  ;;  %v1820_v46 = vld [vmem:[%s3449_s1 + $0x10] sm:$0xf]  ;;  %v2327_v53 = vld [vmem:[%s3453_s5 + $0x58] sm:$0xff]   ;;  %v2111_v58 = vld [vmem:[%s3449_s1 + $0x4] sm:$0xf0] }
  0x14   :  { %v2430_v30 = vpack.i.bf16 %v2233_v29, %v2232_v28  ;;  %v1821_v49 = vor.u32 %v2113_v47, %v1820_v46  ;;  %v2284_v55 = vunpack.c.l.bf16 %v2327_v53  ;;  %v2285_v56 = vunpack.c.h.bf16 %v2327_v53  ;;  %v2148_v61 = vld [vmem:[%s3451_s3 + $0x30] sm:$0xff]  ;;  %v2310_v1 = vld [vmem:[%s3452_s4 + $0x48] sm:$0xff]   ;;  %v1870_v10 = vld [vmem:[%s3449_s1 + $0x78] sm:$0xf0] }
  0x15   :  { %v2435_v36 = vpack.i.bf16 %v2297_v33, %v2296_v32  ;;  %v2450_v48 = vpack.i.bf16 %v2225_v45, %v2224_v44  ;;  %v1813_v60 = vor.u32 %v2111_v58, %v1812_v57  ;;  %v2212_v3 = vunpack.c.l.bf16 %v2310_v1  ;;  %v2103_v6 = vld [vmem:[%s3448_s0 + $0x4] sm:$0xf0]  ;;  %v2124_v7 = vld [vmem:[%s3449_s1 + $0x74] sm:$0xf]  ;;  %v2122_v20 = vld [vmem:[%s3449_s1 + $0x64] sm:$0xf] }
  0x16   :  { %2371 = vperm.xlu0 %2337, %v2370_v37   ;;  %v1829_v37 = vor.u32 %v2115_v35, %v1828_v34  ;;  %v2465_v59 = vpack.i.bf16 %v2285_v56, %v2284_v55  ;;  %v2213_v4 = vunpack.c.h.bf16 %v2310_v1  ;;  %v1862_v21 = vld [vmem:[%s3449_s1 + $0x68] sm:$0xf0]  ;;  %v2149_v24 = vld [vmem:[%s3451_s3 + $0x38] sm:$0xff]  ;;  %v1788_v32 = vld [vmem:[%s3448_s0 + $0x10] sm:$0xf]  ;;  %vm1582_vm2 = vcmask 1043456  }
  0x17   :  { %2376 = vperm.xlu1 %2348, %v2375_v38   ;;  %2381 = vperm.xlu2 %2359, %v2380_v39   ;;  %v2147_v38 = vld [vmem:[%s3451_s3 + $0x28] sm:$0xff]  ;;  %v1865_v23 = vor.u32 %v2122_v20, %v1862_v21  ;;  %v2105_v33 = vld [vmem:[%s3448_s0 + $0x14] sm:$0xf0]  ;;  %v2120_v34 = vld [vmem:[%s3449_s1 + $0x54] sm:$0xf] }
  0x18   :  { %v2329_v39 = vld [vmem:[%s3453_s5 + $0x68] sm:$0xff]   ;;  %v2480_v9 = vpack.i.bf16 %v2213_v4, %v2212_v3  ;;  %v2792_v35 = vor.u32 %v2105_v33, %v1788_v32  ;;  %v2118_v44 = vld [vmem:[%s3449_s1 + $0x44] sm:$0xf]  ;;  %v1796_v55 = vld [vmem:[%s3448_s0 + $0x20] sm:$0xf] }
  0x19   :  { %323 = vmatpush.bf16.xpose.msra.mxu1 %v1861_v11  ;;  %v2292_v40 = vunpack.c.l.bf16 %v2329_v39  ;;  %v2293_v41 = vunpack.c.h.bf16 %v2329_v39  ;;  %v1873_v11 = vor.u32 %v2124_v7, %v1870_v10  ;;  %v2314_v39 = vld [vmem:[%s3452_s4 + $0x68] sm:$0xff]   ;;  %v2116_v57 = vld [vmem:[%s3449_s1 + $0x34] sm:$0xf]  ;;  %v2109_v20 = vld [vmem:[%s3448_s0 + $0x34] sm:$0xf0] }
  0x1a   :  { %2003 = vmatmul.msk.bf16.gmra.mxu0 %vm583_vm0, %v2143_v43  ;;  %v2229_v42 = vunpack.c.h.bf16 %v2314_v39  ;;  %v1846_v45 = vld [vmem:[%s3449_s1 + $0x48] sm:$0xf0]  ;;  %v2107_v56 = vld [vmem:[%s3448_s0 + $0x24] sm:$0xf0]  ;;  %v2311_v1 = vld [vmem:[%s3452_s4 + $0x50] sm:$0xff]  }
  0x1b   :  { %v2445_v43 = vpack.i.bf16 %v2293_v41, %v2292_v40  ;;  %v2228_v41 = vunpack.c.l.bf16 %v2314_v39  ;;  %v1849_v46 = vor.u32 %v2118_v44, %v1846_v45  ;;  %v2216_v3 = vunpack.c.l.bf16 %v2311_v1  ;;  %v2151_v10 = vld [vmem:[%s3451_s3 + $0x48] sm:$0xff]  ;;  %v2112_v21 = vld [vmem:[%s3449_s1 + $0x14] sm:$0xf] }
  0x1c   :  { %v2217_v4 = vunpack.c.h.bf16 %v2311_v1  ;;  %v1782_v1 = vld [vmem:[%s3448_s0 + $0x8] sm:$0xf0] }
  0x1e   :  { %2386 = vperm.xlu0 %2337, %v2385_v50   ;;  %v2312_v50 = vld [vmem:[%s3452_s4 + $0x58] sm:$0xff]   ;;  %v2470_v7 = vpack.i.bf16 %v2217_v4, %v2216_v3 }
  0x1f   :  { %2391 = vperm.xlu1 %2348, %v2390_v51   ;;  %2396 = vperm.xlu2 %2359, %v2395_v52   ;;  %v2220_v51 = vunpack.c.l.bf16 %v2312_v50  ;;  %v2221_v52 = vunpack.c.h.bf16 %v2312_v50 }
  0x21   :  { %324 = vmatpush.bf16.xpose.msra.mxu1 %v1853_v15  ;;  %v2460_v54 = vpack.i.bf16 %v2221_v52, %v2220_v51  ;;  %v2324_v15 = vld [vmem:[%s3453_s5 + $0x40] sm:$0xff]  }
  0x22   :  { %v2272_v17 = vunpack.c.l.bf16 %v2324_v15  ;;  %v2328_v51 = vld [vmem:[%s3453_s5 + $0x60] sm:$0xff]  }
  0x23   :  { %v2288_v53 = vunpack.c.l.bf16 %v2328_v51 }
  0x26   :  { %2401 = vperm.xlu0 %2337, %v2400_v62   ;;  %v2326_v62 = vld [vmem:[%s3453_s5 + $0x50] sm:$0xff]  }
  0x27   :  { %2406 = vperm.xlu1 %2348, %v2405_v63   ;;  %2411 = vperm.xlu2 %2359, %v2410_v0   ;;  %v2280_v63 = vunpack.c.l.bf16 %v2326_v62  ;;  %v2281_v0 = vunpack.c.h.bf16 %v2326_v62 }
  0x29   :  { %325 = vmatpush.bf16.xpose.msra.mxu1 %v1845_v18  ;;  %v2273_v18 = vunpack.c.h.bf16 %v2324_v15 }
  0x2a   :  { %2004 = vmatmul.msk.bf16.gmra.mxu0 %vm583_vm0, %v2144_v2  ;;  %v2475_v2 = vpack.i.bf16 %v2281_v0, %v2280_v63 }
  0x2b   :  { %v2495_v22 = vpack.i.bf16 %v2273_v18, %v2272_v17  ;;  %v1804_v18 = vld [vmem:[%s3448_s0 + $0x30] sm:$0xf] }
  0x2e   :  { %2416 = vperm.xlu0 %2337, %v2415_v5   ;;  %v1780_v5 = vld [vmem:[%s3448_s0] sm:$0xf] }
  0x2f   :  { %2421 = vperm.xlu1 %2348, %v2420_v26   ;;  %v2750_v8 = vor.u32 %v2103_v6, %v1780_v5  ;;  %v2331_v26 = vld [vmem:[%s3453_s5 + $0x78] sm:$0xff]   ;;  %v2114_v5 = vld [vmem:[%s3449_s1 + $0x24] sm:$0xf]  ;;  %v1830_v6 = vld [vmem:[%s3449_s1 + $0x28] sm:$0xf0] }
  0x30   :  { %v2300_v28 = vunpack.c.l.bf16 %v2331_v26  ;;  %v2301_v29 = vunpack.c.h.bf16 %v2331_v26 }
  0x31   :  { %326 = vmatpush.bf16.xpose.msra.mxu1 %v1837_v27 }
  0x36   :  { %2431 = vperm.xlu0 %2337, %v2430_v30   ;;  %v2425_v30 = vpack.i.bf16 %v2301_v29, %v2300_v28  ;;  %v2873_v28 = vor.u32 %v2109_v20, %v1804_v18 }
  0x37   :  { %2436 = vperm.xlu1 %2348, %v2435_v36   ;;  %v1854_v36 = vld [vmem:[%s3449_s1 + $0x58] sm:$0xf0] }
  0x38   :  { %2426 = vperm.xlu2 %2359, %v2425_v30  }
  0x39   :  { %327 = vmatpush.bf16.xpose.msra.mxu1 %v1829_v37  ;;  %v1857_v37 = vor.u32 %v2120_v34, %v1854_v36 }
  0x3a   :  { %2005 = vmatmul.msk.bf16.gmra.mxu0 %vm583_vm0, %v2145_v12  ;;  %v2309_v12 = vld [vmem:[%s3452_s4 + $0x40] sm:$0xff]  }
  0x3b   :  { %v2208_v13 = vunpack.c.l.bf16 %v2309_v12  ;;  %v2209_v14 = vunpack.c.h.bf16 %v2309_v12 }
  0x3d   :  { %v2490_v16 = vpack.i.bf16 %v2209_v14, %v2208_v13  ;;  %v2325_v13 = vld [vmem:[%s3453_s5 + $0x48] sm:$0xff]  }
  0x3e   :  { %2446 = vperm.xlu0 %2337, %v2445_v43   ;;  %v2440_v43 = vpack.i.bf16 %v2229_v42, %v2228_v41  ;;  %v2276_v14 = vunpack.c.l.bf16 %v2325_v13  ;;  %v2277_v15 = vunpack.c.h.bf16 %v2325_v13 }
  0x3f   :  { %2451 = vperm.xlu1 %2348, %v2450_v48   ;;  %v2150_v48 = vld [vmem:[%s3451_s3 + $0x40] sm:$0xff] }
  0x40   :  { %2441 = vperm.xlu2 %2359, %v2440_v43  }
  0x41   :  { %328 = vmatpush.bf16.xpose.msra.mxu1 %v1821_v49 }
  0x46   :  { %2461 = vperm.xlu0 %2337, %v2460_v54   ;;  %v2289_v54 = vunpack.c.h.bf16 %v2328_v51  ;;  %v2110_v51 = vld [vmem:[%s3449_s1 + $0x4] sm:$0xf] }
  0x47   :  { %2466 = vperm.xlu1 %2348, %v2465_v59   ;;  %v1838_v59 = vld [vmem:[%s3449_s1 + $0x38] sm:$0xf0] }
  0x48   :  { %v2455_v58 = vpack.i.bf16 %v2289_v54, %v2288_v53  ;;  %v1814_v53 = vld [vmem:[%s3449_s1 + $0x8] sm:$0xf0] }
  0x49   :  { %329 = vmatpush.bf16.xpose.msra.mxu1 %v1813_v60  ;;  %v2836_v60 = vor.u32 %v2107_v56, %v1796_v55  ;;  %v1817_v56 = vor.u32 %v2110_v51, %v1814_v53 }
  0x4a   :  { %2006 = vmatmul.msk.bf16.gmra.mxu0 %vm583_vm0, %v2146_v19  ;;  %2456 = vperm.xlu2 %2359, %v2455_v58   ;;  %v2152_v58 = vld [vmem:[%s3451_s3 + $0x50] sm:$0xff] }
  0x4e   :  { %2476 = vperm.xlu0 %2337, %v2475_v2  }
  0x4f   :  { %2481 = vperm.xlu1 %2348, %v2480_v9   ;;  %v1833_v9 = vor.u32 %v2114_v5, %v1830_v6 }
  0x50   :  { %330 = vmatmul.bf16.vlgmr.msra.gmra.mxu1 %v2750_v8 }
  0x51   :  { %351 = vmatpush.bf16.xpose.msrb.mxu1 %v1873_v11 }
  0x52   :  { %2471 = vperm.xlu2 %2359, %v2470_v7  }
  0x56   :  { %2491 = vperm.xlu0 %2337, %v2490_v16  }
  0x57   :  { %2496 = vperm.xlu1 %2348, %v2495_v22  }
  0x59   :  { %352 = vmatpush.bf16.xpose.msrb.mxu1 %v1865_v23  ;;  %v2485_v23 = vpack.i.bf16 %v2277_v15, %v2276_v14 }
  0x5a   :  { %2007 = vmatmul.msk.bf16.gmra.mxu0 %vm583_vm0, %v2147_v38 }
  0x5b   :  { %2486 = vperm.xlu2 %2359, %v2485_v23  }
  0x60   :  { %335 = vmatmul.bf16.gmra.mxu1 %v2792_v35 }
  0x61   :  { %v2762_v19 = vpop.permute.xlu2 %2361  ;;  %353 = vmatpush.bf16.xpose.msrb.mxu1 %v1857_v37 }
  0x69   :  { %v2781_v31 = vpop.permute.xlu2 %2366  ;;  %354 = vmatpush.bf16.xpose.msrb.mxu1 %v1849_v46 }
  0x6a   :  { %2008 = vmatmul.msk.bf16.gmra.mxu0 %vm583_vm0, %v2148_v61  ;;  %v1841_v61 = vor.u32 %v2116_v57, %v1838_v59 }
  0x70   :  { %340 = vmatmul.bf16.gmra.mxu1 %v2836_v60 }
  0x71   :  { %v2811_v47 = vpop.permute.xlu2 %2381  ;;  %355 = vmatpush.bf16.xpose.msrb.mxu1 %v1841_v61 }
  0x72   :  { %v2383_v15 = vunpack.i.l.bf16 %v2811_v47 }
  0x78   :  { %v2773_v25 = vpop.permute.xlu0 %2339 }
  0x79   :  { %v2778_v27 = vpop.permute.xlu1 %2350  ;;  %v2838_v63 = vpop.permute.xlu2 %2396  ;;  %356 = vmatpush.bf16.xpose.msrb.mxu1 %v1833_v9 }
  0x7a   :  { %2009 = vmatmul.msk.bf16.gmra.mxu0 %vm583_vm0, %v2149_v24  ;;  %v1822_v24 = vld [vmem:[%s3449_s1 + $0x18] sm:$0xf0]  ;;  %v2399_v5 = vunpack.i.h.bf16 %v2838_v63  ;;  %v2398_v6 = vunpack.i.l.bf16 %v2838_v63  ;;  %v2104_v63 = vld [vmem:[%s3448_s0 + $0x14] sm:$0xf] }
  0x7b   :  { %v1825_v32 = vor.u32 %v2112_v21, %v1822_v24 }
  0x80   :  { %v2797_v38 = vpop.permute.xlu0 %2344  ;;  %345 = vmatmul.bf16.gmra.mxu1 %v2873_v28 }
  0x81   :  { %v2803_v40 = vpop.permute.xlu1 %2355  ;;  %v2412_v16 = vpop.permute.xlu2 %2411  ;;  %357 = vmatpush.bf16.xpose.msrb.mxu1 %v1825_v32 }
  0x82   :  { %v2414_v29 = vunpack.i.h.bf16 %v2412_v16  ;;  %v2413_v30 = vunpack.i.l.bf16 %v2412_v16  ;;  %v1790_v16 = vld [vmem:[%s3448_s0 + $0x18] sm:$0xf0] }
  0x83   :  { %v2929_v18 = vor.u32 %v2104_v63, %v1790_v16  ;;  %v2140_v63 = vld [vmem:[%s3449_s1 + $0xf4] sm:$0xf]  ;;  %v2342_v16 = vunpack.i.h.bf16 %v2773_v25 }
  0x87   :  { %v644_v49 = vpop.f32.mrf.mxu0 }
  0x88   :  { %v2816_v50 = vpop.permute.xlu0 %2371  ;;  %v948_v42 = vmul.f32 %v2413_v30, %v644_v49 }
  0x89   :  { %v2821_v52 = vpop.permute.xlu1 %2376  ;;  %358 = vmatpush.bf16.xpose.msrb.mxu1 %v1817_v56  ;;  %v2156_v56 = vld [vmem:[%s3451_s3 + $0x70] sm:$0xff] }
  0x8a   :  { %2010 = vmatmul.msk.bf16.gmra.mxu0 %vm583_vm0, %v2150_v48 }
  0x8f   :  { %v646_v62 = vpop.f32.mrf.mxu0 }
  0x90   :  { %v2840_v0 = vpop.permute.xlu0 %2386  ;;  %v949_v43 = vmul.f32 %v2414_v29, %v646_v62  ;;  %v2102_v62 = vld [vmem:[%s3448_s0 + $0x4] sm:$0xf] }
  0x91   :  { %v2846_v2 = vpop.permute.xlu1 %2391  ;;  %v2906_v4 = vor.u32 %v2102_v62, %v1782_v1  ;;  %v2389_v20 = vunpack.i.h.bf16 %v2840_v0  ;;  %v2388_v21 = vunpack.i.l.bf16 %v2840_v0  ;;  %v2106_v0 = vld [vmem:[%s3448_s0 + $0x24] sm:$0xf] }
  0x92   :  { %v2393_v61 = vunpack.i.l.bf16 %v2846_v2  ;;  %v2394_v3 = vunpack.i.h.bf16 %v2846_v2  ;;  %v2153_v2 = vld [vmem:[%s3451_s3 + $0x58] sm:$0xff] }
  0x93   :  { %359 = vmatmul.bf16.vlgmr.msrb.gmra.mxu1 %v2906_v4 }
  0x97   :  { %v649_v11 = vpop.f32.mrf.mxu0 }
  0x98   :  { %v2402_v12 = vpop.permute.xlu0 %2401 }
  0x99   :  { %v2403_v17 = vunpack.i.l.bf16 %v2402_v12  ;;  %v2407_v22 = vpop.permute.xlu1 %2406  ;;  %v2404_v26 = vunpack.i.h.bf16 %v2402_v12 }
  0x9a   :  { %2011 = vmatmul.msk.bf16.gmra.mxu0 %vm583_vm0, %v2151_v10  ;;  %v2409_v34 = vunpack.i.h.bf16 %v2407_v22  ;;  %v2408_v36 = vunpack.i.l.bf16 %v2407_v22 }
  0x9b   :  { %v950_v33 = vmul.f32 %v2403_v17, %v649_v11  ;;  %v2384_v17 = vunpack.i.h.bf16 %v2811_v47  ;;  %v2154_v47 = vld [vmem:[%s3451_s3 + $0x60] sm:$0xff] }
  0x9d   :  { %v2876_v46 = vadd.f32 %v2408_v36, %v950_v33  ;;  %v1798_v33 = vld [vmem:[%s3448_s0 + $0x28] sm:$0xf0] }
  0x9f   :  { %v651_v37 = vpop.f32.mrf.mxu0 }
  0xa0   :  { %v951_v39 = vmul.f32 %v2404_v26, %v651_v37  ;;  %v2417_v41 = vpop.permute.xlu0 %2416  ;;  %v2155_v37 = vld [vmem:[%s3451_s3 + $0x68] sm:$0xff] }
  0xa1   :  { %v2419_v44 = vunpack.i.h.bf16 %v2417_v41  ;;  %v2418_v45 = vunpack.i.l.bf16 %v2417_v41  ;;  %v2962_v41 = vpop.permute.xlu1 %2421 }
  0xa2   :  { %v2878_v48 = vadd.f32 %v2409_v34, %v951_v39  ;;  %v2952_v34 = vor.u32 %v2106_v0, %v1798_v33  ;;  %v2352_v0 = vunpack.i.l.bf16 %v2778_v27  ;;  %v2347_v33 = vunpack.i.h.bf16 %v2797_v38 }
  0xa3   :  { %v2886_v54 = vadd.f32 %v2418_v45, %v948_v42  ;;  %v2888_v55 = vadd.f32 %v2419_v44, %v949_v43  ;;  %364 = vmatmul.bf16.gmra.mxu1 %v2929_v18  ;;  %v2108_v42 = vld [vmem:[%s3448_s0 + $0x34] sm:$0xf]  ;;  %v1806_v43 = vld [vmem:[%s3448_s0 + $0x38] sm:$0xf0] }
  0xa4   :  { %v2971_v44 = vor.u32 %v2108_v42, %v1806_v43  ;;  %v2364_v43 = vunpack.i.h.bf16 %v2762_v19 }
  0xa7   :  { %v654_v59 = vpop.f32.mrf.mxu0 }
  0xa8   :  { %v952_v7 = vmul.f32 %v2393_v61, %v654_v59  ;;  %v2973_v45 = vpop.permute.xlu0 %2431 }
  0xa9   :  { %v2976_v53 = vpop.permute.xlu1 %2436 }
  0xaa   :  { %2012 = vmatmul.msk.bf16.gmra.mxu0 %vm583_vm0, %v2152_v58  ;;  %v2911_v11 = vadd.f32 %v2398_v6, %v952_v7  ;;  %v2157_v7 = vld [vmem:[%s3451_s3 + $0x78] sm:$0xff]  ;;  %s2529_s3 = smov 128  }
  0xaf   :  { %v656_v9 = vpop.f32.mrf.mxu0 }
  0xb0   :  { %v953_v10 = vmul.f32 %v2394_v3, %v656_v9  ;;  %v2981_v59 = vpop.permute.xlu0 %2446 }
  0xb1   :  { %v2986_v62 = vpop.permute.xlu1 %2451 }
  0xb2   :  { %v2913_v12 = vadd.f32 %v2399_v5, %v953_v10  ;;  %v2990_v5 = vpop.permute.xlu2 %2426 }
  0xb3   :  { %369 = vmatmul.bf16.gmra.mxu1 %v2952_v34 }
  0xb4   :  { %v1246_v13 = vpack.c.bf16 %v2913_v12, %v2911_v11  ;;  %v1902_v11 = vld [vmem:[%s3449_s1 + $0xb8] sm:$0xf0] }
  0xb7   :  { %v659_v14 = vpop.f32.mrf.mxu0 }
  0xb8   :  { %v954_v22 = vmul.f32 %v2383_v15, %v659_v14  ;;  %v2988_v3 = vpop.permute.xlu0 %2461  ;;  %v1932_v14 = vld [vmem:[%s3449_s1 + $0xf0] sm:$0xf]  ;;  %v2141_v15 = vld [vmem:[%s3449_s1 + $0xf4] sm:$0xf0] }
  0xb9   :  { %v2997_v9 = vpop.permute.xlu1 %2466 }
  0xba   :  { %2013 = vmatmul.msk.bf16.gmra.mxu0 %vm583_vm0, %v2153_v2  ;;  %v2934_v26 = vadd.f32 %v2388_v21, %v954_v22  ;;  %v2341_v2 = vunpack.i.l.bf16 %v2773_v25  ;;  %v1933_v21 = vor.u32 %v2141_v15, %v1932_v14  ;;  %v1934_v22 = vld [vmem:[%s3449_s1 + $0xf8] sm:$0xf0]  ;;  %v2346_v25 = vunpack.i.l.bf16 %v2797_v38 }
  0xbb   :  { %v2363_v15 = vunpack.i.l.bf16 %v2762_v19  ;;  %v2369_v38 = vunpack.i.h.bf16 %v2781_v31  ;;  %v2138_v19 = vld [vmem:[%s3449_s1 + $0xe4] sm:$0xf] }
  0xbc   :  { %380 = vmatpush.bf16.xpose.msra.mxu2 %v1933_v21  ;;  %v1926_v21 = vld [vmem:[%s3449_s1 + $0xe8] sm:$0xf0] }
  0xbf   :  { %v661_v23 = vpop.f32.mrf.mxu0 }
  0xc0   :  { %v955_v24 = vmul.f32 %v2384_v17, %v661_v23  ;;  %v2353_v17 = vunpack.i.h.bf16 %v2778_v27  ;;  %v3017_v23 = vpop.permute.xlu2 %2441  ;;  %v2357_v27 = vunpack.i.l.bf16 %v2803_v40 }
  0xc1   :  { %v3027_v57 = vpop.permute.xlu1 %2481 }
  0xc2   :  { %v2936_v29 = vadd.f32 %v2389_v20, %v955_v24  ;;  %v3012_v20 = vpop.permute.xlu0 %2476 }
  0xc3   :  { %374 = vmatmul.bf16.gmra.mxu1 %v2971_v44 }
  0xc4   :  { %v1247_v30 = vpack.c.bf16 %v2936_v29, %v2934_v26  ;;  %v2132_v26 = vld [vmem:[%s3449_s1 + $0xb4] sm:$0xf]  ;;  %v2484_v29 = vunpack.i.h.bf16 %v3027_v57 }
  0xc7   :  { %v2943_v32 = vpop.f32.mrf.mxu0 }
  0xca   :  { %2014 = vmatmul.msk.bf16.gmra.mxu0 %vm583_vm0, %v2154_v47  ;;  %v1937_v47 = vor.u32 %v2140_v63, %v1934_v22 }
  0xcc   :  { %409 = vmatpush.bf16.xpose.msra.mxu3 %v1937_v47 }
  0xcd   :  { %v2984_v61 = vpop.f32.mrf.mxu1 }
  0xcf   :  { %v2954_v36 = vpop.f32.mrf.mxu0 }
  0xd5   :  { %v2992_v6 = vpop.f32.mrf.mxu1 }
  0xd7   :  { %v2960_v39 = vpop.f32.mrf.mxu0 }
  0xda   :  { %2015 = vmatmul.msk.bf16.gmra.mxu0 %vm583_vm0, %v2155_v37 }
  0xdd   :  { %v3019_v24 = vpop.f32.mrf.mxu1 }
  0xdf   :  { %v671_v51 = vpop.f32.mrf.mxu0 }
  0xe5   :  { %v3044_v47 = vpop.f32.mrf.mxu1 }
  0xe7   :  { %v674_v58 = vpop.f32.mrf.mxu0 }
  0xe8   :  { %v960_v63 = vmul.f32 %v2352_v0, %v674_v58  ;;  %v1929_v0 = vor.u32 %v2138_v19, %v1926_v21 }
  0xea   :  { %2016 = vmatmul.msk.bf16.gmra.mxu0 %vm583_vm0, %v2156_v56  ;;  %v2358_v56 = vunpack.i.h.bf16 %v2803_v40  ;;  %v959_v40 = vmul.f32 %v2364_v43, %v671_v51  ;;  %v3049_v51 = vpop.permute.xlu2 %2456  ;;  %410 = vmatpush.bf16.xpose.msra.mxu3 %v1929_v0  ;;  %v2379_v43 = vunpack.i.h.bf16 %v2821_v52 }
  0xed   :  { %v3067_v19 = vpop.f32.mrf.mxu1 }
  0xef   :  { %v676_v1 = vpop.f32.mrf.mxu0 }
  0xf7   :  { %v679_v10 = vpop.f32.mrf.mxu0 }
  0xf8   :  { %v962_v37 = vmul.f32 %v2341_v2, %v679_v10  ;;  %v2374_v10 = vunpack.i.h.bf16 %v2816_v50  ;;  %v1924_v2 = vld [vmem:[%s3449_s1 + $0xe0] sm:$0xf] }
  0xfa   :  { %2017 = vmatmul.msk.bf16.gmra.mxu0 %vm583_vm0, %v2157_v7  ;;  %v961_v7 = vmul.f32 %v2353_v17, %v676_v1  ;;  %v1218_v22 = vadd.f32 %v2346_v25, %v962_v37  ;;  %v2139_v1 = vld [vmem:[%s3449_s1 + $0xe4] sm:$0xf0]  ;;  %v2373_v25 = vunpack.i.l.bf16 %v2816_v50  ;;  %v958_v37 = vmul.f32 %v2363_v15, %v2960_v39  ;;  %v2497_v15 = vpop.permute.xlu1 %2496 }
  0xfb   :  { %v1925_v17 = vor.u32 %v2139_v1, %v1924_v2  ;;  %v1918_v1 = vld [vmem:[%s3449_s1 + $0xd8] sm:$0xf0] }
  0xfc   :  { %v1217_v58 = vadd.f32 %v2358_v56, %v961_v7  ;;  %v957_v56 = vmul.f32 %v2374_v10, %v2954_v36  ;;  %v1215_v7 = vadd.f32 %v2369_v38, %v959_v40  ;;  %v956_v50 = vmul.f32 %v2373_v25, %v2943_v32  ;;  %v2136_v36 = vld [vmem:[%s3449_s1 + $0xd4] sm:$0xf] }
  0xfd   :  { %381 = vmatpush.bf16.xpose.msra.mxu2 %v1925_v17  ;;  %v1921_v40 = vor.u32 %v2136_v36, %v1918_v1  ;;  %v2498_v17 = vunpack.i.l.bf16 %v2497_v15  ;;  %v2133_v36 = vld [vmem:[%s3449_s1 + $0xb4] sm:$0xf0] }
  0xfe   :  { %v1213_v38 = vadd.f32 %v2379_v43, %v957_v56  ;;  %v1908_v43 = vld [vmem:[%s3449_s1 + $0xc0] sm:$0xf]  ;;  %v2134_v56 = vld [vmem:[%s3449_s1 + $0xc4] sm:$0xf] }
  0xff   :  { %v681_v42 = vpop.f32.mrf.mxu0  ;;  %411 = vmatpush.bf16.xpose.msra.mxu3 %v1921_v40 }
 0x100   :  { %v963_v14 = vmul.f32 %v2342_v16, %v681_v42  ;;  %v1216_v42 = vadd.f32 %v2357_v27, %v960_v63  ;;  %v1916_v27 = vld [vmem:[%s3449_s1 + $0xd0] sm:$0xf]  ;;  %v2137_v63 = vld [vmem:[%s3449_s1 + $0xd4] sm:$0xf0] }
 0x101   :  { %v1917_v32 = vor.u32 %v2137_v63, %v1916_v27  ;;  %v1900_v63 = vld [vmem:[%s3449_s1 + $0xb0] sm:$0xf] }
 0x102   :  { %v1219_v49 = vadd.f32 %v2347_v33, %v963_v14  ;;  %v2368_v33 = vunpack.i.l.bf16 %v2781_v31  ;;  %v2492_v14 = vpop.permute.xlu0 %2491  ;;  %v2378_v31 = vunpack.i.l.bf16 %v2821_v52 }
 0x103   :  { %v2493_v39 = vunpack.i.l.bf16 %v2492_v14  ;;  %v2494_v52 = vunpack.i.h.bf16 %v2492_v14 }
 0x104   :  { %v1251_v16 = vpack.c.bf16 %v1219_v49, %v1218_v22  ;;  %v1250_v22 = vpack.c.bf16 %v1217_v58, %v1216_v42  ;;  %v1214_v2 = vadd.f32 %v2368_v33, %v958_v37  ;;  %v1212_v58 = vadd.f32 %v2378_v31, %v956_v50  ;;  %v3069_v37 = vpop.permute.xlu2 %2471  ;;  %v3089_v50 = vpop.f32.mrf.mxu1 }
 0x105   :  { %382 = vmatpush.bf16.xpose.msra.mxu2 %v1917_v32  ;;  %v3459_v32 = vpack.c.bf16 %v2878_v48, %v2876_v46  ;;  %v2131_v46 = vld [vmem:[%s3449_s1 + $0xa4] sm:$0xf0]  ;;  %v2130_v48 = vld [vmem:[%s3449_s1 + $0xa4] sm:$0xf] }
 0x106   :  { %1260 = vmatpush.bf16.msra.mxu1 %v1251_v16  ;;  %v1249_v10 = vpack.c.bf16 %v1215_v7, %v1214_v2  ;;  %v2499_v16 = vunpack.i.h.bf16 %v2497_v15  ;;  %v1248_v25 = vpack.c.bf16 %v1213_v38, %v1212_v58  ;;  %v2483_v15 = vunpack.i.l.bf16 %v3027_v57 }
 0x107   :  { %v684_v49 = vpop.f32.mrf.mxu0 }
 0x108   :  { %v964_v21 = vmul.f32 %v2493_v39, %v684_v49  ;;  %v2135_v49 = vld [vmem:[%s3449_s1 + $0xc4] sm:$0xf0] }
 0x109   :  { %v1909_v7 = vor.u32 %v2135_v49, %v1908_v43  ;;  %v2473_v43 = vunpack.i.l.bf16 %v3069_v37  ;;  %v2173_v49 = vld [vmem:[%s3454_s6 + $0x78] sm:$0xff] }
 0x10a   :  { %1261 = vmatpush.bf16.msra.mxu1 %v1250_v22  ;;  %v3071_v42 = vadd.f32 %v2498_v17, %v964_v21  ;;  %v1910_v22 = vld [vmem:[%s3449_s1 + $0xc8] sm:$0xf0]  ;;  %v1892_v17 = vld [vmem:[%s3449_s1 + $0xa0] sm:$0xf] }
 0x10b   :  { %v1913_v2 = vor.u32 %v2134_v56, %v1910_v22  ;;  %v1893_v21 = vor.u32 %v2131_v46, %v1892_v17  ;;  %v1884_v56 = vld [vmem:[%s3449_s1 + $0x90] sm:$0xf]  ;;  %v2128_v22 = vld [vmem:[%s3449_s1 + $0x94] sm:$0xf] }
 0x10c   :  { %v2487_v27 = vpop.permute.xlu2 %2486  ;;  %v3111_v12 = vpop.f32.mrf.mxu1 }
 0x10d   :  { %383 = vmatpush.bf16.xpose.msra.mxu2 %v1909_v7  ;;  %412 = vmatpush.bf16.xpose.msra.mxu3 %v1913_v2  ;;  %v2489_v38 = vunpack.i.h.bf16 %v2487_v27  ;;  %v2129_v7 = vld [vmem:[%s3449_s1 + $0x94] sm:$0xf0]  ;;  %v2474_v2 = vunpack.i.h.bf16 %v3069_v37 }
 0x10e   :  { %1262 = vmatpush.bf16.msra.mxu1 %v1249_v10 }
 0x10f   :  { %v686_v0 = vpop.f32.mrf.mxu0 }
 0x110   :  { %v965_v33 = vmul.f32 %v2494_v52, %v686_v0  ;;  %v2488_v52 = vunpack.i.l.bf16 %v2487_v27  ;;  %v1894_v0 = vld [vmem:[%s3449_s1 + $0xa8] sm:$0xf0]  ;;  %v1886_v27 = vld [vmem:[%s3449_s1 + $0x98] sm:$0xf0] }
 0x112   :  { %v3073_v14 = vadd.f32 %v2499_v16, %v965_v33  ;;  %1263 = vmatpush.bf16.msra.mxu1 %v1248_v25  ;;  %v3460_v16 = vpack.c.bf16 %v2888_v55, %v2886_v54  ;;  %v1897_v33 = vor.u32 %v2130_v48, %v1894_v0  ;;  %v2463_v0 = vunpack.i.l.bf16 %v2988_v3 }
 0x114   :  { %v1252_v31 = vpack.c.bf16 %v3073_v14, %v3071_v42  ;;  %v3137_v55 = vpop.f32.mrf.mxu1 }
 0x116   :  { %1264 = vmatpush.bf16.msra.mxu1 %v1247_v30  ;;  %v1901_v30 = vor.u32 %v2133_v36, %v1900_v63  ;;  %v1889_v36 = vor.u32 %v2128_v22, %v1886_v27 }
 0x117   :  { %v689_v39 = vpop.f32.mrf.mxu0 }
 0x118   :  { %v966_v10 = vmul.f32 %v2483_v15, %v689_v39  ;;  %384 = vmatpush.bf16.xpose.msra.mxu2 %v1901_v30  ;;  %v1500_v39 = vsel %vm583_vm0, %v2173_v49, 0  ;;  %v1885_v15 = vor.u32 %v2129_v7, %v1884_v56  ;;  %v2469_v56 = vunpack.i.h.bf16 %v2997_v9 }
 0x119   :  { %v2468_v7 = vunpack.i.l.bf16 %v2997_v9  ;;  %v2165_v9 = vld [vmem:[%s3454_s6 + $0x38] sm:$0xff] }
 0x11a   :  { %1265 = vmatpush.bf16.msra.mxu1 %v1246_v13  ;;  %v1905_v13 = vor.u32 %v2132_v26, %v1902_v11  ;;  %v3116_v57 = vadd.f32 %v2488_v52, %v966_v10  ;;  %v2479_v26 = vunpack.i.h.bf16 %v3012_v20  ;;  %v2172_v10 = vld [vmem:[%s3454_s6 + $0x70] sm:$0xff] }
 0x11c   :  { %413 = vmatpush.bf16.xpose.msra.mxu3 %v1905_v13  ;;  %v360_v63 = vpop.f32.mrf.mxu1 }
 0x11d   :  { %v3161_v11 = vadd.f32 %v360_v63, %v2984_v61  ;;  %v2127_v61 = vld [vmem:[%s3449_s1 + $0x84] sm:$0xf0] }
 0x11e   :  { %1266 = vmatpush.bf16.msra.mxu1 %v3459_v32  ;;  %v2126_v32 = vld [vmem:[%s3449_s1 + $0x84] sm:$0xf] }
 0x11f   :  { %v691_v1 = vpop.f32.mrf.mxu0 }
 0x120   :  { %v967_v40 = vmul.f32 %v2484_v29, %v691_v1  ;;  %385 = vmatpush.bf16.xpose.msra.mxu2 %v1893_v21  ;;  %v2478_v29 = vunpack.i.l.bf16 %v3012_v20  ;;  %v1876_v20 = vld [vmem:[%s3449_s1 + $0x80] sm:$0xf]  ;;  %v1497_v1 = vsel %vm583_vm0, %v2172_v10, 0 }
 0x122   :  { %v3118_v58 = vadd.f32 %v2489_v38, %v967_v40  ;;  %1267 = vmatpush.bf16.msra.mxu1 %v3460_v16  ;;  %v1877_v40 = vor.u32 %v2127_v61, %v1876_v20  ;;  %v1878_v16 = vld [vmem:[%s3449_s1 + $0x88] sm:$0xf0] }
 0x123   :  { %v1881_v48 = vor.u32 %v2126_v32, %v1878_v16 }
 0x124   :  { %v1253_v54 = vpack.c.bf16 %v3118_v58, %v3116_v57  ;;  %414 = vmatpush.bf16.xpose.msra.mxu3 %v1897_v33  ;;  %v3185_v46 = vpop.f32.mrf.mxu1  ;;  %v2171_v33 = vld [vmem:[%s3454_s6 + $0x68] sm:$0xff] }
 0x125   :  { %1268 = vmatmul.bf16.vlgmr.msra.gmra.mxu1 %v2750_v8 }
 0x126   :  { %1515 = vmatpush.bf16.xpose.msrb.mxu1 %v1500_v39 }
 0x127   :  { %v694_v25 = vpop.f32.mrf.mxu0 }
 0x128   :  { %v968_v30 = vmul.f32 %v2473_v43, %v694_v25  ;;  %386 = vmatpush.bf16.xpose.msra.mxu2 %v1885_v15  ;;  %v2464_v25 = vunpack.i.h.bf16 %v2988_v3  ;;  %v1494_v43 = vsel %vm583_vm0, %v2171_v33, 0  ;;  %v2162_v33 = vld [vmem:[%s3454_s6 + $0x20] sm:$0xff] }
 0x12a   :  { %v3163_v38 = vadd.f32 %v2478_v29, %v968_v30 }
 0x12c   :  { %415 = vmatpush.bf16.xpose.msra.mxu3 %v1889_v36  ;;  %v365_v49 = vpop.f32.mrf.mxu1 }
 0x12e   :  { %1516 = vmatpush.bf16.xpose.msrb.mxu1 %v1497_v1  ;;  %v2168_v1 = vld [vmem:[%s3454_s6 + $0x50] sm:$0xff] }
 0x12f   :  { %v696_v37 = vpop.f32.mrf.mxu0  ;;  %v1485_v16 = vsel %vm583_vm0, %v2168_v1, 0  ;;  %v2434_v1 = vunpack.i.h.bf16 %v2973_v45 }
 0x130   :  { %v969_v13 = vmul.f32 %v2474_v2, %v696_v37  ;;  %387 = vmatpush.bf16.xpose.msra.mxu2 %v1877_v40  ;;  %v3198_v2 = vadd.f32 %v365_v49, %v3019_v24  ;;  %v1476_v24 = vsel %vm583_vm0, %v2165_v9, 0  ;;  %v2169_v37 = vld [vmem:[%s3454_s6 + $0x58] sm:$0xff]  ;;  %v2163_v40 = vld [vmem:[%s3454_s6 + $0x28] sm:$0xff]  ;;  %v2160_v9 = vld [vmem:[%s3454_s6 + $0x10] sm:$0xff] }
 0x131   :  { %v1488_v10 = vsel %vm583_vm0, %v2169_v37, 0 }
 0x132   :  { %v3165_v52 = vadd.f32 %v2479_v26, %v969_v13  ;;  %v2164_v13 = vld [vmem:[%s3454_s6 + $0x30] sm:$0xff] }
 0x133   :  { %v1473_v20 = vsel %vm583_vm0, %v2164_v13, 0 }
 0x134   :  { %v1254_v17 = vpack.c.bf16 %v3165_v52, %v3163_v38  ;;  %416 = vmatpush.bf16.xpose.msra.mxu3 %v1881_v48  ;;  %v367_v26 = vpop.f32.mrf.mxu1 }
 0x135   :  { %1273 = vmatmul.bf16.gmra.mxu1 %v2792_v35  ;;  %v3216_v29 = vadd.f32 %v367_v26, %v3044_v47 }
 0x136   :  { %1517 = vmatpush.bf16.xpose.msrb.mxu1 %v1494_v43  ;;  %v1467_v43 = vsel %vm583_vm0, %v2162_v33, 0 }
 0x137   :  { %v699_v21 = vpop.f32.mrf.mxu0  ;;  %388 = vmatmul.bf16.vlgmr.msra.gmra.mxu2 %v2750_v8  ;;  %v2170_v8 = vld [vmem:[%s3454_s6 + $0x60] sm:$0xff] }
 0x138   :  { %v970_v22 = vmul.f32 %v2463_v0, %v699_v21  ;;  %v1491_v63 = vsel %vm583_vm0, %v2170_v8, 0  ;;  %v2167_v0 = vld [vmem:[%s3454_s6 + $0x48] sm:$0xff] }
 0x13a   :  { %v3201_v27 = vadd.f32 %v2468_v7, %v970_v22  ;;  %v2166_v7 = vld [vmem:[%s3454_s6 + $0x40] sm:$0xff]  ;;  %v2161_v22 = vld [vmem:[%s3454_s6 + $0x18] sm:$0xff] }
 0x13b   :  { %417 = vmatmul.bf16.vlgmr.msra.gmra.mxu3 %v2906_v4 }
 0x13c   :  { %1502 = vmatpush.bf16.xpose.msrb.mxu3 %v1476_v24  ;;  %v370_v61 = vpop.f32.mrf.mxu1  ;;  %v1461_v24 = vsel %vm583_vm0, %v2160_v9, 0 }
 0x13d   :  { %v3231_v47 = vadd.f32 %v370_v61, %v3067_v19  ;;  %v2424_v61 = vunpack.i.h.bf16 %v2962_v41 }
 0x13e   :  { %1518 = vmatpush.bf16.xpose.msrb.mxu1 %v1491_v63  ;;  %v1338_v63 = vld [vmem:[%s3450_s2] sm:$0x3] }
 0x13f   :  { %v701_v39 = vpop.f32.mrf.mxu0 }
 0x140   :  { %v971_v15 = vmul.f32 %v2464_v25, %v701_v39  ;;  %v1482_v25 = vsel %vm583_vm0, %v2167_v0, 0  ;;  %v1479_v39 = vsel %vm583_vm0, %v2166_v7, 0  ;;  %v2428_v0 = vunpack.i.l.bf16 %v2990_v5 }
 0x142   :  { %v3203_v3 = vadd.f32 %v2469_v56, %v971_v15  ;;  %v1464_v15 = vsel %vm583_vm0, %v2161_v22, 0 }
 0x144   :  { %v1255_v36 = vpack.c.bf16 %v3203_v3, %v3201_v27  ;;  %1503 = vmatpush.bf16.xpose.msrb.mxu3 %v1473_v20  ;;  %v372_v48 = vpop.f32.mrf.mxu1  ;;  %v2423_v20 = vunpack.i.l.bf16 %v2962_v41 }
 0x145   :  { %1278 = vmatmul.bf16.gmra.mxu1 %v2836_v60  ;;  %v3245_v19 = vadd.f32 %v372_v48, %v3089_v50  ;;  %v2429_v48 = vunpack.i.h.bf16 %v2990_v5  ;;  %v2454_v5 = vunpack.i.h.bf16 %v2986_v62 }
 0x146   :  { %1519 = vmatpush.bf16.xpose.msrb.mxu1 %v1488_v10  ;;  %v2158_v10 = vld [vmem:[%s3454_s6] sm:$0xff] }
 0x147   :  { %v3219_v30 = vpop.f32.mrf.mxu0  ;;  %393 = vmatmul.bf16.gmra.mxu2 %v2792_v35  ;;  %v1470_v35 = vsel %vm583_vm0, %v2163_v40, 0 }
 0x14b   :  { %422 = vmatmul.bf16.gmra.mxu3 %v2929_v18 }
 0x14c   :  { %1504 = vmatpush.bf16.xpose.msrb.mxu3 %v1470_v35  ;;  %v375_v49 = vpop.f32.mrf.mxu1 }
 0x14d   :  { %v3258_v50 = vadd.f32 %v375_v49, %v3111_v12  ;;  %v2444_v49 = vunpack.i.h.bf16 %v3017_v23 }
 0x14e   :  { %1520 = vmatpush.bf16.xpose.msrb.mxu1 %v1485_v16  ;;  %v2433_v16 = vunpack.i.l.bf16 %v2973_v45 }
 0x14f   :  { %v3233_v32 = vpop.f32.mrf.mxu0 }
 0x154   :  { %1505 = vmatpush.bf16.xpose.msrb.mxu3 %v1467_v43  ;;  %v2439_v43 = vunpack.i.h.bf16 %v2976_v53 }
 0x155   :  { %1283 = vmatmul.bf16.gmra.mxu1 %v2873_v28 }
 0x156   :  { %1521 = vmatpush.bf16.xpose.msrb.mxu1 %v1482_v25 }
 0x157   :  { %v709_v21 = vpop.f32.mrf.mxu0  ;;  %398 = vmatmul.bf16.gmra.mxu2 %v2836_v60  ;;  %v377_v60 = vpop.f32.mrf.mxu1 }
 0x158   :  { %v3270_v12 = vadd.f32 %v377_v60, %v3137_v55  ;;  %v2159_v55 = vld [vmem:[%s3454_s6 + $0x8] sm:$0xff] }
 0x159   :  { %v1458_v37 = vsel %vm583_vm0, %v2159_v55, 0 }
 0x15b   :  { %427 = vmatmul.bf16.gmra.mxu3 %v2952_v34 }
 0x15c   :  { %1506 = vmatpush.bf16.xpose.msrb.mxu3 %v1464_v15  ;;  %v2443_v15 = vunpack.i.l.bf16 %v3017_v23 }
 0x15e   :  { %1522 = vmatpush.bf16.xpose.msrb.mxu1 %v1479_v39  ;;  %v2438_v39 = vunpack.i.l.bf16 %v2976_v53  ;;  %v974_v55 = vmul.f32 %v2443_v15, %v709_v21  ;;  %v973_v53 = vmul.f32 %v2454_v5, %v3233_v32 }
 0x15f   :  { %v711_v56 = vpop.f32.mrf.mxu0 }
 0x160   :  { %v975_v60 = vmul.f32 %v2444_v49, %v711_v56  ;;  %v2459_v56 = vunpack.i.h.bf16 %v3049_v51 }
 0x164   :  { %1507 = vmatpush.bf16.xpose.msrb.mxu3 %v1461_v24  ;;  %v2449_v24 = vunpack.i.h.bf16 %v2981_v59 }
 0x165   :  { %2083 = vmatmul.msk.bf16.vlgmr.msrb.gmra.mxu1 %vm583_vm0, %v1338_v63 }
 0x167   :  { %v714_v8 = vpop.f32.mrf.mxu0  ;;  %403 = vmatmul.bf16.gmra.mxu2 %v2873_v28  ;;  %v1455_v28 = vsel %vm583_vm0, %v2158_v10, 0  ;;  %v2458_v10 = vunpack.i.l.bf16 %v3049_v51 }
 0x168   :  { %v976_v7 = vmul.f32 %v2433_v16, %v714_v8  ;;  %v2448_v8 = vunpack.i.l.bf16 %v2981_v59  ;;  %v1539_v16 = vld [vmem:[%s3456_s8] sm:$0x3] }
 0x16b   :  { %432 = vmatmul.bf16.gmra.mxu3 %v2971_v44 }
 0x16c   :  { %1508 = vmatpush.bf16.xpose.msrb.mxu3 %v1458_v37  ;;  %v1232_v37 = vadd.f32 %v2438_v39, %v976_v7 }
 0x16f   :  { %v716_v26 = vpop.f32.mrf.mxu0 }
 0x170   :  { %v977_v33 = vmul.f32 %v2434_v1, %v716_v26  ;;  %v2453_v26 = vunpack.i.l.bf16 %v2986_v62 }
 0x172   :  { %v1233_v45 = vadd.f32 %v2439_v43, %v977_v33 }
 0x174   :  { %1509 = vmatpush.bf16.xpose.msrb.mxu3 %v1455_v28  ;;  %v1258_v23 = vpack.c.bf16 %v1233_v45, %v1232_v37  ;;  %v1229_v28 = vadd.f32 %v2459_v56, %v973_v53 }
 0x177   :  { %v719_v13 = vpop.f32.mrf.mxu0 }
 0x178   :  { %v978_v40 = vmul.f32 %v2423_v20, %v719_v13  ;;  %v1231_v13 = vadd.f32 %v2449_v24, %v975_v60  ;;  %v972_v20 = vmul.f32 %v2453_v26, %v3219_v30 }
 0x17a   :  { %v1234_v22 = vadd.f32 %v2428_v0, %v978_v40  ;;  %v1228_v62 = vadd.f32 %v2458_v10, %v972_v20  ;;  %v2527_v40 = vmov 0.0   ;;  %v1540_v0 = vunpack.c.l.bf16 %v1539_v16 }
 0x17b   :  { %2082 = vmatmul.msk.bf16.vlgmr.msrb.gmra.mxu3 %vm583_vm0, %v1338_v63  ;;  %v1230_v63 = vadd.f32 %v2448_v8, %v974_v55  ;;  %58 = vst.msk [vmem:[#allocation3] sm:$0xff] %vm57_vm1, %v2527_v40 }
 0x17c   :  { %v1256_v21 = vpack.c.bf16 %v1229_v28, %v1228_v62  ;;  %59 = vst.msk [vmem:[#allocation3 + $0x8] sm:$0xff] %vm57_vm1, %v2527_v40  ;;  %v1543_v49 = vperm.slane %v1540_v0, 2  ;;  %v1542_v56 = vperm.slane %v1540_v0, 0 }
 0x17d   :  { %60 = vst.msk [vmem:[#allocation3 + $0x10] sm:$0xff] %vm57_vm1, %v2527_v40 }
 0x17e   :  { %61 = vst.msk [vmem:[#allocation3 + $0x18] sm:$0xff] %vm57_vm1, %v2527_v40  ;;  %v1546_v20 = vperm.slane %v1542_v56, 0  ;;  %v1719_v56 = vld [vmem:[%s3457_s9] sm:$0x3]  ;;  %s2528_s9 = smov [#allocation4]  }
 0x17f   :  { %v721_v35 = vpop.f32.mrf.mxu0  ;;  %62 = vst.msk [vmem:[#allocation3 + $0x20] sm:$0xff] %vm57_vm1, %v2527_v40  ;;  %s1764_s24 = sshll.u32 %s2528_s9, 4  ;;  %s1765_s24 = int_to_ptr.vmem [resolvable:$true] %s1764_s24 }
 0x180   :  { %v979_v25 = vmul.f32 %v2424_v61, %v721_v35  ;;  %v1257_v61 = vpack.c.bf16 %v1231_v13, %v1230_v63  ;;  %63 = vst.msk [vmem:[#allocation3 + $0x28] sm:$0xff] %vm57_vm1, %v2527_v40 }
 0x181   :  { %64 = vst.msk [vmem:[#allocation3 + $0x30] sm:$0xff] %vm57_vm1, %v2527_v40 }
 0x182   :  { %v1235_v41 = vadd.f32 %v2429_v48, %v979_v25  ;;  %65 = vst.msk [vmem:[#allocation3 + $0x38] sm:$0xff] %vm57_vm1, %v2527_v40  ;;  %v1236_v62 = vld [vmem:[#allocation3] sm:$0xff] }
 0x184   :  { %v1259_v9 = vpack.c.bf16 %v1235_v41, %v1234_v22  ;;  %v1547_v22 = vperm.slane %v1543_v49, 0 }
 0x186   :  { %1289 = vmatpush.bf16.msrb.mxu2 %v1259_v9 }
 0x18a   :  { %1290 = vmatpush.bf16.msrb.mxu2 %v1258_v23 }
 0x18e   :  { %1291 = vmatpush.bf16.msrb.mxu2 %v1257_v61 }
 0x192   :  { %1292 = vmatpush.bf16.msrb.mxu2 %v1256_v21 }
 0x196   :  { %1293 = vmatpush.bf16.msrb.mxu2 %v1255_v36 }
 0x19a   :  { %1294 = vmatpush.bf16.msrb.mxu2 %v1254_v17 }
 0x19e   :  { %1295 = vmatpush.bf16.msrb.mxu2 %v1253_v54 }
 0x1a2   :  { %1296 = vmatpush.bf16.msrb.mxu2 %v1252_v31  ;;  %v3322_v59 = vpop.f32.mrf.mxu1 }
 0x1a5   :  { %1297 = vmatmul.bf16.vlgmr.msrb.gmra.mxu2 %v2906_v4 }
 0x1aa   :  { %v3324_v51 = vpop.f32.mrf.mxu1 }
 0x1b2   :  { %v3327_v27 = vpop.f32.mrf.mxu1 }
 0x1b5   :  { %1302 = vmatmul.bf16.gmra.mxu2 %v2929_v18 }
 0x1ba   :  { %v3329_v38 = vpop.f32.mrf.mxu1  ;;  %v389_v52 = vpop.f32.mrf.mxu2 }
 0x1be   :  { %v418_v17 = vpop.f32.mrf.mxu3 }
 0x1bf   :  { %v3331_v57 = vadd.f32 %v418_v17, %v389_v52 }
 0x1c2   :  { %v3334_v42 = vpop.f32.mrf.mxu1  ;;  %v391_v14 = vpop.f32.mrf.mxu2 }
 0x1c5   :  { %1307 = vmatmul.bf16.gmra.mxu2 %v2952_v34  ;;  %v1528_v34 = vld [vmem:[%s3455_s7] sm:$0x3] }
 0x1c6   :  { %v420_v4 = vpop.f32.mrf.mxu3 }
 0x1c7   :  { %v3336_v31 = vadd.f32 %v420_v4, %v391_v14  ;;  %v1237_v14 = vld [vmem:[#allocation3 + $0x8] sm:$0xff] }
 0x1ca   :  { %v3338_v58 = vpop.f32.mrf.mxu1  ;;  %v394_v54 = vpop.f32.mrf.mxu2 }
 0x1ce   :  { %v423_v18 = vpop.f32.mrf.mxu3 }
 0x1cf   :  { %v3340_v3 = vadd.f32 %v423_v18, %v394_v54 }
 0x1d2   :  { %v3343_v36 = vpop.f32.mrf.mxu1  ;;  %v396_v30 = vpop.f32.mrf.mxu2 }
 0x1d5   :  { %1312 = vmatmul.bf16.gmra.mxu2 %v2971_v44  ;;  %v1529_v44 = vunpack.c.l.bf16 %v1528_v34 }
 0x1d6   :  { %v425_v32 = vpop.f32.mrf.mxu3 }
 0x1d7   :  { %v3345_v1 = vadd.f32 %v425_v32, %v396_v30  ;;  %v1532_v33 = vperm.slane %v1529_v44, 2  ;;  %v1531_v23 = vperm.slane %v1529_v44, 0  ;;  %v1238_v32 = vld [vmem:[#allocation3 + $0x10] sm:$0xff] }
 0x1d9   :  { %v1536_v7 = vperm.slane %v1532_v33, 0  ;;  %v1535_v10 = vperm.slane %v1531_v23, 0 }
 0x1da   :  { %v3356_v35 = vpop.f32.mrf.mxu1  ;;  %v399_v48 = vpop.f32.mrf.mxu2 }
 0x1de   :  { %v428_v25 = vpop.f32.mrf.mxu3 }
 0x1df   :  { %v3362_v43 = vadd.f32 %v428_v25, %v399_v48 }
 0x1e2   :  { %v401_v41 = vpop.f32.mrf.mxu2  ;;  %v1524_v39 = vpop.f32.mrf.mxu1 }
 0x1e3   :  { %v1538_v15 = vmul.f32 %v1536_v7, %v1524_v39 }
 0x1e5   :  { %v1549_v9 = vadd.f32 %v1547_v22, %v1538_v15 }
 0x1e6   :  { %v430_v60 = vpop.f32.mrf.mxu3 }
 0x1e7   :  { %v3365_v45 = vadd.f32 %v430_v60, %v401_v41  ;;  %2093 = vmatpush.msk.msra.mxu2 %vm1582_vm2, %v1549_v9 }
 0x1ea   :  { %v404_v24 = vpop.f32.mrf.mxu2  ;;  %v1526_v5 = vpop.f32.mrf.mxu1 }
 0x1ee   :  { %v433_v26 = vpop.f32.mrf.mxu3 }
 0x1ef   :  { %v3368_v55 = vadd.f32 %v433_v26, %v404_v24 }
 0x1f2   :  { %v406_v37 = vpop.f32.mrf.mxu2 }
 0x1f6   :  { %v435_v8 = vpop.f32.mrf.mxu3 }
 0x1f7   :  { %v3370_v53 = vadd.f32 %v435_v8, %v406_v37 }
 0x1fe   :  { %v1511_v13 = vpop.f32.mrf.mxu3 }
 0x1ff   :  { %v1537_v63 = vmul.f32 %v1535_v10, %v1511_v13  ;;  %v1720_v10 = vunpack.c.l.bf16 %v1719_v56 }
 0x201   :  { %v1548_v61 = vadd.f32 %v1546_v20, %v1537_v63  ;;  %v1722_v20 = vperm.slane %v1720_v10, 0 }
 0x203   :  { %2084 = vmatpush.msk.msra.mxu3 %vm1582_vm2, %v1548_v61 }
 0x206   :  { %v1513_v28 = vpop.f32.mrf.mxu3 }
 0x228   :  { %v1298_v21 = vpop.f32.mrf.mxu2 }
 0x229   :  { %v1299_v52 = vadd.f32 %v1298_v21, %v3322_v59 }
 0x22b   :  { %v1318_v17 = vadd.f32 %v1299_v52, %v1236_v62  ;;  %v3408_v62 = vperm.slane %v1722_v20, 0 }
 0x22d   :  { %1327 = vst.msk [vmem:[#allocation3] sm:$0xff] %vm57_vm1, %v1318_v17 }
 0x230   :  { %v1300_v4 = vpop.f32.mrf.mxu2 }
 0x231   :  { %v1301_v54 = vadd.f32 %v1300_v4, %v3324_v51  ;;  %v1239_v51 = vld [vmem:[#allocation3 + $0x18] sm:$0xff] }
 0x233   :  { %v1319_v18 = vadd.f32 %v1301_v54, %v1237_v14 }
 0x234   :  { %v1550_v30 = vld [vmem:[#allocation3] sm:$0xff] }
 0x235   :  { %1328 = vst.msk [vmem:[#allocation3 + $0x8] sm:$0xff] %vm57_vm1, %v1319_v18  ;;  %2085 = vmatmul.msk.f32.vlgmr.msra.gmra.mxu3 %vm57_vm1, %v1550_v30  ;;  %2094 = vmatmul.msk.f32.vlgmr.msra.gmra.mxu2 %vm57_vm1, %v1550_v30 }
 0x238   :  { %v1303_v34 = vpop.f32.mrf.mxu2 }
 0x239   :  { %v1304_v40 = vadd.f32 %v1303_v34, %v3327_v27  ;;  %v1240_v27 = vld [vmem:[#allocation3 + $0x20] sm:$0xff]  ;;  %v363_v34 = vadd.f32 %v3185_v46, %v2992_v6 }
 0x23b   :  { %v1320_v59 = vadd.f32 %v1304_v40, %v1238_v32 }
 0x23c   :  { %v1551_v16 = vld [vmem:[#allocation3 + $0x8] sm:$0xff] }
 0x23d   :  { %1329 = vst.msk [vmem:[#allocation3 + $0x10] sm:$0xff] %vm57_vm1, %v1320_v59  ;;  %2086 = vmatmul.msk.f32.gmra.mxu3 %vm57_vm1, %v1551_v16  ;;  %2095 = vmatmul.msk.f32.gmra.mxu2 %vm57_vm1, %v1551_v16 }
 0x240   :  { %v1305_v44 = vpop.f32.mrf.mxu2 }
 0x241   :  { %v1306_v48 = vadd.f32 %v1305_v44, %v3329_v38  ;;  %v1241_v38 = vld [vmem:[#allocation3 + $0x28] sm:$0xff] }
 0x243   :  { %v1321_v0 = vadd.f32 %v1306_v48, %v1239_v51 }
 0x244   :  { %v1552_v33 = vld [vmem:[#allocation3 + $0x10] sm:$0xff] }
 0x245   :  { %1330 = vst.msk [vmem:[#allocation3 + $0x18] sm:$0xff] %vm57_vm1, %v1321_v0  ;;  %2087 = vmatmul.msk.f32.gmra.mxu3 %vm57_vm1, %v1552_v33  ;;  %2096 = vmatmul.msk.f32.gmra.mxu2 %vm57_vm1, %v1552_v33 }
 0x248   :  { %v1308_v25 = vpop.f32.mrf.mxu2 }
 0x249   :  { %v1309_v49 = vadd.f32 %v1308_v25, %v3334_v42  ;;  %v1242_v42 = vld [vmem:[#allocation3 + $0x30] sm:$0xff] }
 0x24b   :  { %v1322_v7 = vadd.f32 %v1309_v49, %v1240_v27 }
 0x24c   :  { %v1553_v22 = vld [vmem:[#allocation3 + $0x18] sm:$0xff] }
 0x24d   :  { %1331 = vst.msk [vmem:[#allocation3 + $0x20] sm:$0xff] %vm57_vm1, %v1322_v7  ;;  %2088 = vmatmul.msk.f32.gmra.mxu3 %vm57_vm1, %v1553_v22  ;;  %2097 = vmatmul.msk.f32.gmra.mxu2 %vm57_vm1, %v1553_v22 }
 0x250   :  { %v1310_v41 = vpop.f32.mrf.mxu2 }
 0x251   :  { %v1311_v39 = vadd.f32 %v1310_v41, %v3338_v58  ;;  %v1243_v58 = vld [vmem:[#allocation3 + $0x38] sm:$0xff] }
 0x253   :  { %v1323_v15 = vadd.f32 %v1311_v39, %v1241_v38 }
 0x254   :  { %v1554_v60 = vld [vmem:[#allocation3 + $0x20] sm:$0xff] }
 0x255   :  { %1332 = vst.msk [vmem:[#allocation3 + $0x28] sm:$0xff] %vm57_vm1, %v1323_v15  ;;  %2089 = vmatmul.msk.f32.gmra.mxu3 %vm57_vm1, %v1554_v60  ;;  %2098 = vmatmul.msk.f32.gmra.mxu2 %vm57_vm1, %v1554_v60 }
 0x258   :  { %v1313_v9 = vpop.f32.mrf.mxu2 }
 0x259   :  { %v1314_v24 = vadd.f32 %v1313_v9, %v3343_v36 }
 0x25b   :  { %v1324_v5 = vadd.f32 %v1314_v24, %v1242_v42 }
 0x25c   :  { %v1555_v26 = vld [vmem:[#allocation3 + $0x28] sm:$0xff] }
 0x25d   :  { %1333 = vst.msk [vmem:[#allocation3 + $0x30] sm:$0xff] %vm57_vm1, %v1324_v5  ;;  %2090 = vmatmul.msk.f32.gmra.mxu3 %vm57_vm1, %v1555_v26  ;;  %2099 = vmatmul.msk.f32.gmra.mxu2 %vm57_vm1, %v1555_v26 }
 0x260   :  { %v1315_v37 = vpop.f32.mrf.mxu2 }
 0x261   :  { %v1316_v8 = vadd.f32 %v1315_v37, %v3356_v35  ;;  %v1723_v35 = vperm.slane %v1720_v10, 2 }
 0x263   :  { %v1325_v13 = vadd.f32 %v1316_v8, %v1243_v58  ;;  %v3410_v52 = vperm.slane %v1723_v35, 0 }
 0x264   :  { %v1556_v23 = vld [vmem:[#allocation3 + $0x30] sm:$0xff] }
 0x265   :  { %1334 = vst.msk [vmem:[#allocation3 + $0x38] sm:$0xff] %vm57_vm1, %v1325_v13  ;;  %2091 = vmatmul.msk.f32.gmra.mxu3 %vm57_vm1, %v1556_v23  ;;  %2100 = vmatmul.msk.f32.gmra.mxu2 %vm57_vm1, %v1556_v23 }
 0x26c   :  { %v1557_v36 = vld [vmem:[#allocation3 + $0x38] sm:$0xff] }
 0x26d   :  { %2092 = vmatmul.msk.f32.gmra.mxu3 %vm57_vm1, %v1557_v36  ;;  %2101 = vmatmul.msk.f32.gmra.mxu2 %vm57_vm1, %v1557_v36 }
 0x2b8   :  { %v1606_v63 = vpop.f32.mrf.mxu3  ;;  %v1647_v28 = vpop.f32.mrf.mxu2 }
 0x2b9   :  { %v1687_v61 = vmul.f32 0.25, %v1606_v63  ;;  %v1688_v21 = vmul.f32 0.25, %v1647_v28 }
 0x2bb   :  { %v1703_v17 = vadd.f32 %v1687_v61, %v3161_v11  ;;  %v1704_v14 = vadd.f32 %v1688_v21, %v3331_v57 }
 0x2bd   :  { %v1728_v4 = vadd.f32 %v3408_v62, %v1703_v17  ;;  %v1729_v54 = vadd.f32 %v3410_v52, %v1704_v14 }
 0x2bf   :  { %v1744_v18 = vpack.c.bf16 %v1729_v54, %v1728_v4 }
 0x2c0   :  { %v1609_v30 = vpop.f32.mrf.mxu3  ;;  %v1650_v32 = vpop.f32.mrf.mxu2 }
 0x2c1   :  { %1752 = vst [vmem:[#allocation4] sm:$0xff] %v1744_v18  ;;  %v1689_v40 = vmul.f32 0.25, %v1609_v30  ;;  %v1690_v59 = vmul.f32 0.25, %v1650_v32 }
 0x2c3   :  { %v1705_v16 = vadd.f32 %v1689_v40, %v363_v34  ;;  %v1706_v51 = vadd.f32 %v1690_v59, %v3336_v31 }
 0x2c5   :  { %v1730_v11 = vadd.f32 %v3408_v62, %v1705_v16  ;;  %v1731_v57 = vadd.f32 %v3410_v52, %v1706_v51 }
 0x2c7   :  { %v1745_v44 = vpack.c.bf16 %v1731_v57, %v1730_v11 }
 0x2c8   :  { %v1612_v48 = vpop.f32.mrf.mxu3  ;;  %v1653_v0 = vpop.f32.mrf.mxu2 }
 0x2c9   :  { %1753 = vst [vmem:[#allocation4 + $0x8] sm:$0xff] %v1745_v44  ;;  %v1691_v33 = vmul.f32 0.25, %v1612_v48  ;;  %v1692_v27 = vmul.f32 0.25, %v1653_v0 }
 0x2cb   :  { %v1707_v25 = vadd.f32 %v1691_v33, %v3198_v2  ;;  %v1708_v6 = vadd.f32 %v1692_v27, %v3340_v3 }
 0x2cd   :  { %v1732_v46 = vadd.f32 %v3408_v62, %v1707_v25  ;;  %v1733_v49 = vadd.f32 %v3410_v52, %v1708_v6 }
 0x2cf   :  { %v1746_v7 = vpack.c.bf16 %v1733_v49, %v1732_v46 }
 0x2d0   :  { %v1615_v31 = vpop.f32.mrf.mxu3  ;;  %v1656_v22 = vpop.f32.mrf.mxu2 }
 0x2d1   :  { %1754 = vst [vmem:[#allocation4 + $0x10] sm:$0xff] %v1746_v7  ;;  %v1693_v38 = vmul.f32 0.25, %v1615_v31  ;;  %v1694_v41 = vmul.f32 0.25, %v1656_v22 }
 0x2d3   :  { %v1709_v39 = vadd.f32 %v1693_v38, %v3216_v29  ;;  %v1710_v15 = vadd.f32 %v1694_v41, %v3345_v1 }
 0x2d5   :  { %v1734_v60 = vadd.f32 %v3408_v62, %v1709_v39  ;;  %v1735_v2 = vadd.f32 %v3410_v52, %v1710_v15 }
 0x2d7   :  { %v1747_v42 = vpack.c.bf16 %v1735_v2, %v1734_v60 }
 0x2d8   :  { %v1618_v3 = vpop.f32.mrf.mxu3  ;;  %v1659_v9 = vpop.f32.mrf.mxu2 }
 0x2d9   :  { %1755 = vst [vmem:[#allocation4 + $0x18] sm:$0xff] %v1747_v42  ;;  %v1695_v24 = vmul.f32 0.25, %v1618_v3  ;;  %v1696_v5 = vmul.f32 0.25, %v1659_v9 }
 0x2db   :  { %v1711_v26 = vadd.f32 %v1695_v24, %v3231_v47  ;;  %v1712_v58 = vadd.f32 %v1696_v5, %v3362_v43 }
 0x2dd   :  { %v1736_v37 = vadd.f32 %v3408_v62, %v1711_v26  ;;  %v1737_v29 = vadd.f32 %v3410_v52, %v1712_v58 }
 0x2df   :  { %v1748_v8 = vpack.c.bf16 %v1737_v29, %v1736_v37 }
 0x2e0   :  { %v1621_v1 = vpop.f32.mrf.mxu3  ;;  %v1662_v13 = vpop.f32.mrf.mxu2 }
 0x2e1   :  { %1756 = vst [vmem:[#allocation4 + $0x20] sm:$0xff] %v1748_v8  ;;  %v1697_v23 = vmul.f32 0.25, %v1621_v1  ;;  %v1698_v36 = vmul.f32 0.25, %v1662_v13 }
 0x2e3   :  { %v1713_v56 = vadd.f32 %v1697_v23, %v3245_v19  ;;  %v1714_v10 = vadd.f32 %v1698_v36, %v3365_v45 }
 0x2e5   :  { %v1738_v20 = vadd.f32 %v3408_v62, %v1713_v56  ;;  %v1739_v47 = vadd.f32 %v3410_v52, %v1714_v10 }
 0x2e7   :  { %v1749_v35 = vpack.c.bf16 %v1739_v47, %v1738_v20 }
 0x2e8   :  { %v1624_v43 = vpop.f32.mrf.mxu3  ;;  %v1665_v63 = vpop.f32.mrf.mxu2 }
 0x2e9   :  { %1757 = vst [vmem:[#allocation4 + $0x28] sm:$0xff] %v1749_v35  ;;  %v1699_v28 = vmul.f32 0.25, %v1624_v43  ;;  %v1700_v61 = vmul.f32 0.25, %v1665_v63 }
 0x2eb   :  { %v1715_v21 = vadd.f32 %v1699_v28, %v3258_v50  ;;  %v1716_v17 = vadd.f32 %v1700_v61, %v3368_v55 }
 0x2ed   :  { %v1740_v14 = vadd.f32 %v3408_v62, %v1715_v21  ;;  %v1741_v19 = vadd.f32 %v3410_v52, %v1716_v17 }
 0x2ef   :  { %v1750_v4 = vpack.c.bf16 %v1741_v19, %v1740_v14 }
 0x2f0   :  { %v1627_v45 = vpop.f32.mrf.mxu3  ;;  %v1668_v54 = vpop.f32.mrf.mxu2 }
 0x2f1   :  { %1758 = vst [vmem:[#allocation4 + $0x30] sm:$0xff] %v1750_v4  ;;  %v1701_v18 = vmul.f32 0.25, %v1627_v45  ;;  %v1702_v30 = vmul.f32 0.25, %v1668_v54 }
 0x2f3   :  { %v1717_v32 = vadd.f32 %v1701_v18, %v3270_v12  ;;  %v1718_v34 = vadd.f32 %v1702_v30, %v3370_v53 }
 0x2f5   :  { %v1742_v50 = vadd.f32 %v3408_v62, %v1717_v32  ;;  %v1743_v55 = vadd.f32 %v3410_v52, %v1718_v34 }
 0x2f7   :  { %v1751_v40 = vpack.c.bf16 %v1743_v55, %v1742_v50 }
 0x2f9   :  { %1759 = vst [vmem:[#allocation4 + $0x38] sm:$0xff] %v1751_v40 }
 0x2fa   :  { %1772 = dma.vmem_to_hbm [thread:$0]  %s1765_s24, 1024, %s1767_s26, [#allocation5], %s2529_s3, %s2529_s3, %s2530_s27  }
 0x2fb   :  { %2524 = dma.done.wait [#allocation5], 1024  }
 0x2fc   :  { %2525 = vsyncadd [#allocation5], 4294966272 }
 0x2fd   :  { %1777 = vsyncpa [#allocation5], 1 }

</bundles_post_ra>
